<compile_context>
chip_gen: v6e
topology: v6e:2x2x1
jax: 0.10.0
libtpu: 0.0.40
codegen_flags: <defaults>
</compile_context>

<pallas_src>
import functools

import jax
import jax.numpy as jnp
from jax.experimental import pallas as pl
from jax.experimental.pallas import tpu as pltpu

# ---- static layer table: (name, out_features N, in_features K) -------------
_LAYERS = (
    ("enc1", 5, 6),
    ("enc2", 4, 5),
    ("heads", 6, 4),   # rows 0..2 = z_mean, rows 3..5 = z_log_var (fused)
    ("dec1", 4, 3),
    ("dec2", 5, 4),
    ("dec3", 6, 5),
)


def _offsets():
    offs, o = {}, 0
    for name, n, k in _LAYERS:
        offs[name] = o
        o += n * k + n        # W (row-major, (out,in)) then bias
    return offs, o


_OFFS, _N_PARAMS = _offsets()   # 166 f32 total -> ~1 KiB SMEM slab


# ---------------------------------------------------------------------------
# Kernel
# ---------------------------------------------------------------------------
def _vae_kernel(p_ref, x_ref, eps_ref, out_ref):
    """p_ref: SMEM (166,) params.  x_ref: (6, T, 128).  eps_ref: (3, T, 128).
    out_ref: (15, T, 128) fused output (z | z_mean | z_log_var | decoded)."""
    leaky = lambda t: jnp.where(t > 0.0, t, 0.01 * t)   # torch default slope
    relu = lambda t: jnp.maximum(t, 0.0)

    def layer(h, name, n_out, k_in, act=None):
        # h: list of k_in full-vreg (T, 128) slabs.
        # out[n] = b[n] + sum_k W[n, k] * h[k]  — scalar splat x full vregs.
        off = _OFFS[name]
        outs = []
        for n in range(n_out):
            acc = p_ref[off + n * k_in] * h[0]
            for k in range(1, k_in):
                acc = acc + p_ref[off + n * k_in + k] * h[k]
            acc = acc + p_ref[off + n_out * k_in + n]           # bias
            outs.append(act(acc) if act is not None else acc)
        return outs

    x = [x_ref[k] for k in range(6)]        # each (T, 128)
    eps = [eps_ref[k] for k in range(3)]

    # encoder: Linear(6,5) -> LeakyReLU -> Linear(5,4) -> LeakyReLU
    h = layer(x, "enc1", 5, 6, leaky)
    h = layer(h, "enc2", 4, 5, leaky)

    # fused latent heads: one (6,4) pass, split as python-list slices (free)
    heads = layer(h, "heads", 6, 4)
    z_mean, z_log_var = heads[:3], heads[3:]

    # reparameterize: z = mu + eps * exp(logvar / 2)
    z = [m + e * jnp.exp(0.5 * lv) for m, e, lv in zip(z_mean, eps, z_log_var)]

    # decoder: Linear(3,4) -> ReLU -> Linear(4,5) -> ReLU -> Linear(5,6)
    d = layer(z, "dec1", 4, 3, relu)
    d = layer(d, "dec2", 5, 4, relu)
    d = layer(d, "dec3", 6, 5)

    # fused output: rows 0-2 z, 3-5 z_mean, 6-8 z_log_var, 9-14 decoded
    for r, row in enumerate(z + z_mean + z_log_var + d):
        out_ref[r] = row


# ---------------------------------------------------------------------------
# Parameters (torch.nn.Linear default init, weight stored (out, in))
# ---------------------------------------------------------------------------
def _init_linear(key, fan_in, fan_out):
    kw, kb = jax.random.split(key)
    bound = 1.0 / jnp.sqrt(jnp.float32(fan_in))
    w = jax.random.uniform(kw, (fan_out, fan_in), jnp.float32, -bound, bound)
    b = jax.random.uniform(kb, (fan_out,), jnp.float32, -bound, bound)
    return w, b


def make_params(seed=0):
    keys = jax.random.split(jax.random.PRNGKey(seed), 7)
    return {
        "enc1": _init_linear(keys[0], 6, 5),
        "enc2": _init_linear(keys[1], 5, 4),
        "z_mean": _init_linear(keys[2], 4, 3),
        "z_log_var": _init_linear(keys[3], 4, 3),
        "dec1": _init_linear(keys[4], 3, 4),
        "dec2": _init_linear(keys[5], 4, 5),
        "dec3": _init_linear(keys[6], 5, 6),
    }


def pack_params(p):
    """Pack all layers into one flat f32 slab (fusing the two latent heads)."""
    wm, bm = p["z_mean"]
    wv, bv = p["z_log_var"]
    fused = {
        "enc1": p["enc1"], "enc2": p["enc2"],
        "heads": (jnp.concatenate([wm, wv], axis=0),
                  jnp.concatenate([bm, bv], axis=0)),
        "dec1": p["dec1"], "dec2": p["dec2"], "dec3": p["dec3"],
    }
    chunks = []
    for name, n, k in _LAYERS:
        w, b = fused[name]
        assert w.shape == (n, k) and b.shape == (n,)
        chunks.append(w.reshape(-1))
        chunks.append(b)
    flat = jnp.concatenate(chunks).astype(jnp.float32)
    assert flat.shape == (_N_PARAMS,)
    return flat


# ---------------------------------------------------------------------------
# Wrapper
# ---------------------------------------------------------------------------
def _round_up(n, m):
    return (n + m - 1) // m * m


def _choose_tile_b(batch, tile_b):
    """Batch-lane tile: multiple of 1024 (full 8x128 f32 vregs per feature row),
    capped for tiny batches, and split so v7x's 2 TensorCores both get work."""
    tile_b = max(1024, (int(tile_b) // 1024) * 1024)
    b_ceil = _round_up(batch, 1024)
    tile_b = min(tile_b, b_ceil)
    if b_ceil >= 2048 and tile_b >= b_ceil:      # ensure >= 2 parallel grid steps
        tile_b = _round_up(b_ceil // 2, 1024)
    return tile_b


@functools.partial(jax.jit, static_argnames=("tile_b",))
def vae_linear_0103_forward(x, eps, params_flat, *, tile_b=16384):
    """x: (B, 6), eps: (B, 3), params_flat: (166,) f32.
    Returns (encoded (B,3), z_mean (B,3), z_log_var (B,3), decoded (B,6))."""
    B = x.shape[0]
    tile_b = _choose_tile_b(B, tile_b)
    assert tile_b % 1024 == 0
    B_pad = _round_up(B, tile_b)
    n_tiles = B_pad // tile_b
    T = tile_b // 128                     # sublane-blocks per tile (multiple of 8)

    # feature-major / batch-on-lanes; fold batch into (B_pad//128, 128) blocks
    # so each feature row is full 8x128 vregs.  pad+transpose fuses to one copy.
    def to_blocks(a, feat):
        a_t = jnp.pad(a.astype(jnp.float32).T, ((0, 0), (0, B_pad - B)))
        return a_t.reshape(feat, B_pad // 128, 128)

    x_t = to_blocks(x, 6)
    eps_t = to_blocks(eps, 3)

    bspec = lambda feat: pl.BlockSpec((feat, T, 128), lambda i, p: (0, i, 0))

    out = pl.pallas_call(
        _vae_kernel,
        out_shape=jax.ShapeDtypeStruct((15, B_pad // 128, 128), jnp.float32),
        grid_spec=pltpu.PrefetchScalarGridSpec(
            num_scalar_prefetch=1,         # param slab -> SMEM, one tiny DMA
            grid=(n_tiles,),
            in_specs=[bspec(6), bspec(3)],
            out_specs=bspec(15),
        ),
        compiler_params=pltpu.CompilerParams(
            dimension_semantics=("parallel",),   # megacore split on v7x
        ),
    )(params_flat, x_t, eps_t)

    # slice padded lanes first, then a single back-transpose for all 4 outputs
    out = out.reshape(15, B_pad)[:, :B].T        # (B, 15)
    encoded = out[:, 0:3]
    z_mean = out[:, 3:6]
    z_log_var = out[:, 6:9]
    decoded = out[:, 9:15]
    return encoded, z_mean, z_log_var, decoded


# ---------------------------------------------------------------------------
# Pure-JAX reference (same math, standard layout) for a correctness check
# ---------------------------------------------------------------------------
def _ref_forward(x, eps, p):
    leaky = lambda t: jnp.where(t > 0, t, 0.01 * t)
    lin = lambda t, wb: t @ wb[0].T + wb[1]
    h = leaky(lin(x, p["enc1"]))
    h = leaky(lin(h, p["enc2"]))
    zm = lin(h, p["z_mean"])
    zlv = lin(h, p["z_log_var"])
    z = zm + eps * jnp.exp(0.5 * zlv)
    d = jnp.maximum(lin(z, p["dec1"]), 0.0)
    d = jnp.maximum(lin(d, p["dec2"]), 0.0)
    d = lin(d, p["dec3"])
    return z, zm, zlv, d


if __name__ == "__main__":
    B = 8
    key = jax.random.PRNGKey(0)
    kx, keps = jax.random.split(key)
    x = jax.random.normal(kx, (B, 6), jnp.float32)
    eps = jax.random.normal(keps, (B, 3), jnp.float32)  # reparameterization noise

    params = make_params(seed=0)
    flat = pack_params(params)

    outs = vae_linear_0103_forward(x, eps, flat)
    jax.block_until_ready(outs)
    encoded, z_mean, z_log_var, decoded = outs

    assert encoded.shape == (B, 3)
    assert z_mean.shape == (B, 3)
    assert z_log_var.shape == (B, 3)
    assert decoded.shape == (B, 6)

    refs = _ref_forward(x, eps, params)
    for got, want in zip(outs, refs):
        assert jnp.allclose(got, want, rtol=1e-4, atol=1e-4)

    print("KERNEL_OK")
</pallas_src>

<mosaic_0001>
module attributes {stable_mosaic.version = 11 : i64} {
  func.func @_vae_kernel(%arg0: i32, %arg1: memref<166xf32, #tpu.memory_space<smem>>, %arg2: memref<6x8x128xf32, #tpu.memory_space<vmem>>, %arg3: memref<3x8x128xf32, #tpu.memory_space<vmem>>, %arg4: memref<15x8x128xf32, #tpu.memory_space<vmem>>) attributes {dimension_semantics = [#tpu.dimension_semantics<parallel>], iteration_bounds = array<i64: 1>, scalar_prefetch = 1 : i64, scratch_operands = 0 : i64, tpu.core_type = #tpu.core_type<tc>, window_params = [{transform_indices = @transform_0, window_bounds = array<i64: 6, 8, 128>}, {transform_indices = @transform_1, window_bounds = array<i64: 3, 8, 128>}, {transform_indices = @transform_2, window_bounds = array<i64: 15, 8, 128>}]} {
    %c0 = arith.constant 0 : index
    %c0_0 = arith.constant 0 : index
    %c0_1 = arith.constant 0 : index
    %0 = vector.load %arg2[%c0, %c0_0, %c0_1] : memref<6x8x128xf32, #tpu.memory_space<vmem>>, vector<1x8x128xf32>
    %1 = vector.shape_cast %0 : vector<1x8x128xf32> to vector<8x128xf32>
    %c1 = arith.constant 1 : index
    %c0_2 = arith.constant 0 : index
    %c0_3 = arith.constant 0 : index
    %2 = vector.load %arg2[%c1, %c0_2, %c0_3] : memref<6x8x128xf32, #tpu.memory_space<vmem>>, vector<1x8x128xf32>
    %3 = vector.shape_cast %2 : vector<1x8x128xf32> to vector<8x128xf32>
    %c2 = arith.constant 2 : index
    %c0_4 = arith.constant 0 : index
    %c0_5 = arith.constant 0 : index
    %4 = vector.load %arg2[%c2, %c0_4, %c0_5] : memref<6x8x128xf32, #tpu.memory_space<vmem>>, vector<1x8x128xf32>
    %5 = vector.shape_cast %4 : vector<1x8x128xf32> to vector<8x128xf32>
    %c3 = arith.constant 3 : index
    %c0_6 = arith.constant 0 : index
    %c0_7 = arith.constant 0 : index
    %6 = vector.load %arg2[%c3, %c0_6, %c0_7] : memref<6x8x128xf32, #tpu.memory_space<vmem>>, vector<1x8x128xf32>
    %7 = vector.shape_cast %6 : vector<1x8x128xf32> to vector<8x128xf32>
    %c4 = arith.constant 4 : index
    %c0_8 = arith.constant 0 : index
    %c0_9 = arith.constant 0 : index
    %8 = vector.load %arg2[%c4, %c0_8, %c0_9] : memref<6x8x128xf32, #tpu.memory_space<vmem>>, vector<1x8x128xf32>
    %9 = vector.shape_cast %8 : vector<1x8x128xf32> to vector<8x128xf32>
    %c5 = arith.constant 5 : index
    %c0_10 = arith.constant 0 : index
    %c0_11 = arith.constant 0 : index
    %10 = vector.load %arg2[%c5, %c0_10, %c0_11] : memref<6x8x128xf32, #tpu.memory_space<vmem>>, vector<1x8x128xf32>
    %11 = vector.shape_cast %10 : vector<1x8x128xf32> to vector<8x128xf32>
    %c0_12 = arith.constant 0 : index
    %c0_13 = arith.constant 0 : index
    %c0_14 = arith.constant 0 : index
    %12 = vector.load %arg3[%c0_12, %c0_13, %c0_14] : memref<3x8x128xf32, #tpu.memory_space<vmem>>, vector<1x8x128xf32>
    %13 = vector.shape_cast %12 : vector<1x8x128xf32> to vector<8x128xf32>
    %c1_15 = arith.constant 1 : index
    %c0_16 = arith.constant 0 : index
    %c0_17 = arith.constant 0 : index
    %14 = vector.load %arg3[%c1_15, %c0_16, %c0_17] : memref<3x8x128xf32, #tpu.memory_space<vmem>>, vector<1x8x128xf32>
    %15 = vector.shape_cast %14 : vector<1x8x128xf32> to vector<8x128xf32>
    %c2_18 = arith.constant 2 : index
    %c0_19 = arith.constant 0 : index
    %c0_20 = arith.constant 0 : index
    %16 = vector.load %arg3[%c2_18, %c0_19, %c0_20] : memref<3x8x128xf32, #tpu.memory_space<vmem>>, vector<1x8x128xf32>
    %17 = vector.shape_cast %16 : vector<1x8x128xf32> to vector<8x128xf32>
    %c0_21 = arith.constant 0 : index
    %18 = memref.load %arg1[%c0_21] : memref<166xf32, #tpu.memory_space<smem>>
    %19 = vector.broadcast %18 : f32 to vector<8x128xf32>
    %20 = arith.mulf %19, %1 : vector<8x128xf32>
    %c1_22 = arith.constant 1 : index
    %21 = memref.load %arg1[%c1_22] : memref<166xf32, #tpu.memory_space<smem>>
    %22 = vector.broadcast %21 : f32 to vector<8x128xf32>
    %23 = arith.mulf %22, %3 : vector<8x128xf32>
    %24 = arith.addf %20, %23 : vector<8x128xf32>
    %c2_23 = arith.constant 2 : index
    %25 = memref.load %arg1[%c2_23] : memref<166xf32, #tpu.memory_space<smem>>
    %26 = vector.broadcast %25 : f32 to vector<8x128xf32>
    %27 = arith.mulf %26, %5 : vector<8x128xf32>
    %28 = arith.addf %24, %27 : vector<8x128xf32>
    %c3_24 = arith.constant 3 : index
    %29 = memref.load %arg1[%c3_24] : memref<166xf32, #tpu.memory_space<smem>>
    %30 = vector.broadcast %29 : f32 to vector<8x128xf32>
    %31 = arith.mulf %30, %7 : vector<8x128xf32>
    %32 = arith.addf %28, %31 : vector<8x128xf32>
    %c4_25 = arith.constant 4 : index
    %33 = memref.load %arg1[%c4_25] : memref<166xf32, #tpu.memory_space<smem>>
    %34 = vector.broadcast %33 : f32 to vector<8x128xf32>
    %35 = arith.mulf %34, %9 : vector<8x128xf32>
    %36 = arith.addf %32, %35 : vector<8x128xf32>
    %c5_26 = arith.constant 5 : index
    %37 = memref.load %arg1[%c5_26] : memref<166xf32, #tpu.memory_space<smem>>
    %38 = vector.broadcast %37 : f32 to vector<8x128xf32>
    %39 = arith.mulf %38, %11 : vector<8x128xf32>
    %40 = arith.addf %36, %39 : vector<8x128xf32>
    %c30 = arith.constant 30 : index
    %41 = memref.load %arg1[%c30] : memref<166xf32, #tpu.memory_space<smem>>
    %42 = vector.broadcast %41 : f32 to vector<8x128xf32>
    %43 = arith.addf %40, %42 : vector<8x128xf32>
    %cst = arith.constant 0.000000e+00 : f32
    %44 = vector.broadcast %cst : f32 to vector<8x128xf32>
    %45 = arith.cmpf ogt, %43, %44 : vector<8x128xf32>
    %cst_27 = arith.constant 0.00999999977 : f32
    %46 = vector.broadcast %cst_27 : f32 to vector<8x128xf32>
    %47 = arith.mulf %46, %43 : vector<8x128xf32>
    %48 = arith.select %45, %43, %47 : vector<8x128xi1>, vector<8x128xf32>
    %c6 = arith.constant 6 : index
    %49 = memref.load %arg1[%c6] : memref<166xf32, #tpu.memory_space<smem>>
    %50 = vector.broadcast %49 : f32 to vector<8x128xf32>
    %51 = arith.mulf %50, %1 : vector<8x128xf32>
    %c7 = arith.constant 7 : index
    %52 = memref.load %arg1[%c7] : memref<166xf32, #tpu.memory_space<smem>>
    %53 = vector.broadcast %52 : f32 to vector<8x128xf32>
    %54 = arith.mulf %53, %3 : vector<8x128xf32>
    %55 = arith.addf %51, %54 : vector<8x128xf32>
    %c8 = arith.constant 8 : index
    %56 = memref.load %arg1[%c8] : memref<166xf32, #tpu.memory_space<smem>>
    %57 = vector.broadcast %56 : f32 to vector<8x128xf32>
    %58 = arith.mulf %57, %5 : vector<8x128xf32>
    %59 = arith.addf %55, %58 : vector<8x128xf32>
    %c9 = arith.constant 9 : index
    %60 = memref.load %arg1[%c9] : memref<166xf32, #tpu.memory_space<smem>>
    %61 = vector.broadcast %60 : f32 to vector<8x128xf32>
    %62 = arith.mulf %61, %7 : vector<8x128xf32>
    %63 = arith.addf %59, %62 : vector<8x128xf32>
    %c10 = arith.constant 10 : index
    %64 = memref.load %arg1[%c10] : memref<166xf32, #tpu.memory_space<smem>>
    %65 = vector.broadcast %64 : f32 to vector<8x128xf32>
    %66 = arith.mulf %65, %9 : vector<8x128xf32>
    %67 = arith.addf %63, %66 : vector<8x128xf32>
    %c11 = arith.constant 11 : index
    %68 = memref.load %arg1[%c11] : memref<166xf32, #tpu.memory_space<smem>>
    %69 = vector.broadcast %68 : f32 to vector<8x128xf32>
    %70 = arith.mulf %69, %11 : vector<8x128xf32>
    %71 = arith.addf %67, %70 : vector<8x128xf32>
    %c31 = arith.constant 31 : index
    %72 = memref.load %arg1[%c31] : memref<166xf32, #tpu.memory_space<smem>>
    %73 = vector.broadcast %72 : f32 to vector<8x128xf32>
    %74 = arith.addf %71, %73 : vector<8x128xf32>
    %cst_28 = arith.constant 0.000000e+00 : f32
    %75 = vector.broadcast %cst_28 : f32 to vector<8x128xf32>
    %76 = arith.cmpf ogt, %74, %75 : vector<8x128xf32>
    %cst_29 = arith.constant 0.00999999977 : f32
    %77 = vector.broadcast %cst_29 : f32 to vector<8x128xf32>
    %78 = arith.mulf %77, %74 : vector<8x128xf32>
    %79 = arith.select %76, %74, %78 : vector<8x128xi1>, vector<8x128xf32>
    %c12 = arith.constant 12 : index
    %80 = memref.load %arg1[%c12] : memref<166xf32, #tpu.memory_space<smem>>
    %81 = vector.broadcast %80 : f32 to vector<8x128xf32>
    %82 = arith.mulf %81, %1 : vector<8x128xf32>
    %c13 = arith.constant 13 : index
    %83 = memref.load %arg1[%c13] : memref<166xf32, #tpu.memory_space<smem>>
    %84 = vector.broadcast %83 : f32 to vector<8x128xf32>
    %85 = arith.mulf %84, %3 : vector<8x128xf32>
    %86 = arith.addf %82, %85 : vector<8x128xf32>
    %c14 = arith.constant 14 : index
    %87 = memref.load %arg1[%c14] : memref<166xf32, #tpu.memory_space<smem>>
    %88 = vector.broadcast %87 : f32 to vector<8x128xf32>
    %89 = arith.mulf %88, %5 : vector<8x128xf32>
    %90 = arith.addf %86, %89 : vector<8x128xf32>
    %c15 = arith.constant 15 : index
    %91 = memref.load %arg1[%c15] : memref<166xf32, #tpu.memory_space<smem>>
    %92 = vector.broadcast %91 : f32 to vector<8x128xf32>
    %93 = arith.mulf %92, %7 : vector<8x128xf32>
    %94 = arith.addf %90, %93 : vector<8x128xf32>
    %c16 = arith.constant 16 : index
    %95 = memref.load %arg1[%c16] : memref<166xf32, #tpu.memory_space<smem>>
    %96 = vector.broadcast %95 : f32 to vector<8x128xf32>
    %97 = arith.mulf %96, %9 : vector<8x128xf32>
    %98 = arith.addf %94, %97 : vector<8x128xf32>
    %c17 = arith.constant 17 : index
    %99 = memref.load %arg1[%c17] : memref<166xf32, #tpu.memory_space<smem>>
    %100 = vector.broadcast %99 : f32 to vector<8x128xf32>
    %101 = arith.mulf %100, %11 : vector<8x128xf32>
    %102 = arith.addf %98, %101 : vector<8x128xf32>
    %c32 = arith.constant 32 : index
    %103 = memref.load %arg1[%c32] : memref<166xf32, #tpu.memory_space<smem>>
    %104 = vector.broadcast %103 : f32 to vector<8x128xf32>
    %105 = arith.addf %102, %104 : vector<8x128xf32>
    %cst_30 = arith.constant 0.000000e+00 : f32
    %106 = vector.broadcast %cst_30 : f32 to vector<8x128xf32>
    %107 = arith.cmpf ogt, %105, %106 : vector<8x128xf32>
    %cst_31 = arith.constant 0.00999999977 : f32
    %108 = vector.broadcast %cst_31 : f32 to vector<8x128xf32>
    %109 = arith.mulf %108, %105 : vector<8x128xf32>
    %110 = arith.select %107, %105, %109 : vector<8x128xi1>, vector<8x128xf32>
    %c18 = arith.constant 18 : index
    %111 = memref.load %arg1[%c18] : memref<166xf32, #tpu.memory_space<smem>>
    %112 = vector.broadcast %111 : f32 to vector<8x128xf32>
    %113 = arith.mulf %112, %1 : vector<8x128xf32>
    %c19 = arith.constant 19 : index
    %114 = memref.load %arg1[%c19] : memref<166xf32, #tpu.memory_space<smem>>
    %115 = vector.broadcast %114 : f32 to vector<8x128xf32>
    %116 = arith.mulf %115, %3 : vector<8x128xf32>
    %117 = arith.addf %113, %116 : vector<8x128xf32>
    %c20 = arith.constant 20 : index
    %118 = memref.load %arg1[%c20] : memref<166xf32, #tpu.memory_space<smem>>
    %119 = vector.broadcast %118 : f32 to vector<8x128xf32>
    %120 = arith.mulf %119, %5 : vector<8x128xf32>
    %121 = arith.addf %117, %120 : vector<8x128xf32>
    %c21 = arith.constant 21 : index
    %122 = memref.load %arg1[%c21] : memref<166xf32, #tpu.memory_space<smem>>
    %123 = vector.broadcast %122 : f32 to vector<8x128xf32>
    %124 = arith.mulf %123, %7 : vector<8x128xf32>
    %125 = arith.addf %121, %124 : vector<8x128xf32>
    %c22 = arith.constant 22 : index
    %126 = memref.load %arg1[%c22] : memref<166xf32, #tpu.memory_space<smem>>
    %127 = vector.broadcast %126 : f32 to vector<8x128xf32>
    %128 = arith.mulf %127, %9 : vector<8x128xf32>
    %129 = arith.addf %125, %128 : vector<8x128xf32>
    %c23 = arith.constant 23 : index
    %130 = memref.load %arg1[%c23] : memref<166xf32, #tpu.memory_space<smem>>
    %131 = vector.broadcast %130 : f32 to vector<8x128xf32>
    %132 = arith.mulf %131, %11 : vector<8x128xf32>
    %133 = arith.addf %129, %132 : vector<8x128xf32>
    %c33 = arith.constant 33 : index
    %134 = memref.load %arg1[%c33] : memref<166xf32, #tpu.memory_space<smem>>
    %135 = vector.broadcast %134 : f32 to vector<8x128xf32>
    %136 = arith.addf %133, %135 : vector<8x128xf32>
    %cst_32 = arith.constant 0.000000e+00 : f32
    %137 = vector.broadcast %cst_32 : f32 to vector<8x128xf32>
    %138 = arith.cmpf ogt, %136, %137 : vector<8x128xf32>
    %cst_33 = arith.constant 0.00999999977 : f32
    %139 = vector.broadcast %cst_33 : f32 to vector<8x128xf32>
    %140 = arith.mulf %139, %136 : vector<8x128xf32>
    %141 = arith.select %138, %136, %140 : vector<8x128xi1>, vector<8x128xf32>
    %c24 = arith.constant 24 : index
    %142 = memref.load %arg1[%c24] : memref<166xf32, #tpu.memory_space<smem>>
    %143 = vector.broadcast %142 : f32 to vector<8x128xf32>
    %144 = arith.mulf %143, %1 : vector<8x128xf32>
    %c25 = arith.constant 25 : index
    %145 = memref.load %arg1[%c25] : memref<166xf32, #tpu.memory_space<smem>>
    %146 = vector.broadcast %145 : f32 to vector<8x128xf32>
    %147 = arith.mulf %146, %3 : vector<8x128xf32>
    %148 = arith.addf %144, %147 : vector<8x128xf32>
    %c26 = arith.constant 26 : index
    %149 = memref.load %arg1[%c26] : memref<166xf32, #tpu.memory_space<smem>>
    %150 = vector.broadcast %149 : f32 to vector<8x128xf32>
    %151 = arith.mulf %150, %5 : vector<8x128xf32>
    %152 = arith.addf %148, %151 : vector<8x128xf32>
    %c27 = arith.constant 27 : index
    %153 = memref.load %arg1[%c27] : memref<166xf32, #tpu.memory_space<smem>>
    %154 = vector.broadcast %153 : f32 to vector<8x128xf32>
    %155 = arith.mulf %154, %7 : vector<8x128xf32>
    %156 = arith.addf %152, %155 : vector<8x128xf32>
    %c28 = arith.constant 28 : index
    %157 = memref.load %arg1[%c28] : memref<166xf32, #tpu.memory_space<smem>>
    %158 = vector.broadcast %157 : f32 to vector<8x128xf32>
    %159 = arith.mulf %158, %9 : vector<8x128xf32>
    %160 = arith.addf %156, %159 : vector<8x128xf32>
    %c29 = arith.constant 29 : index
    %161 = memref.load %arg1[%c29] : memref<166xf32, #tpu.memory_space<smem>>
    %162 = vector.broadcast %161 : f32 to vector<8x128xf32>
    %163 = arith.mulf %162, %11 : vector<8x128xf32>
    %164 = arith.addf %160, %163 : vector<8x128xf32>
    %c34 = arith.constant 34 : index
    %165 = memref.load %arg1[%c34] : memref<166xf32, #tpu.memory_space<smem>>
    %166 = vector.broadcast %165 : f32 to vector<8x128xf32>
    %167 = arith.addf %164, %166 : vector<8x128xf32>
    %cst_34 = arith.constant 0.000000e+00 : f32
    %168 = vector.broadcast %cst_34 : f32 to vector<8x128xf32>
    %169 = arith.cmpf ogt, %167, %168 : vector<8x128xf32>
    %cst_35 = arith.constant 0.00999999977 : f32
    %170 = vector.broadcast %cst_35 : f32 to vector<8x128xf32>
    %171 = arith.mulf %170, %167 : vector<8x128xf32>
    %172 = arith.select %169, %167, %171 : vector<8x128xi1>, vector<8x128xf32>
    %c35 = arith.constant 35 : index
    %173 = memref.load %arg1[%c35] : memref<166xf32, #tpu.memory_space<smem>>
    %174 = vector.broadcast %173 : f32 to vector<8x128xf32>
    %175 = arith.mulf %174, %48 : vector<8x128xf32>
    %c36 = arith.constant 36 : index
    %176 = memref.load %arg1[%c36] : memref<166xf32, #tpu.memory_space<smem>>
    %177 = vector.broadcast %176 : f32 to vector<8x128xf32>
    %178 = arith.mulf %177, %79 : vector<8x128xf32>
    %179 = arith.addf %175, %178 : vector<8x128xf32>
    %c37 = arith.constant 37 : index
    %180 = memref.load %arg1[%c37] : memref<166xf32, #tpu.memory_space<smem>>
    %181 = vector.broadcast %180 : f32 to vector<8x128xf32>
    %182 = arith.mulf %181, %110 : vector<8x128xf32>
    %183 = arith.addf %179, %182 : vector<8x128xf32>
    %c38 = arith.constant 38 : index
    %184 = memref.load %arg1[%c38] : memref<166xf32, #tpu.memory_space<smem>>
    %185 = vector.broadcast %184 : f32 to vector<8x128xf32>
    %186 = arith.mulf %185, %141 : vector<8x128xf32>
    %187 = arith.addf %183, %186 : vector<8x128xf32>
    %c39 = arith.constant 39 : index
    %188 = memref.load %arg1[%c39] : memref<166xf32, #tpu.memory_space<smem>>
    %189 = vector.broadcast %188 : f32 to vector<8x128xf32>
    %190 = arith.mulf %189, %172 : vector<8x128xf32>
    %191 = arith.addf %187, %190 : vector<8x128xf32>
    %c55 = arith.constant 55 : index
    %192 = memref.load %arg1[%c55] : memref<166xf32, #tpu.memory_space<smem>>
    %193 = vector.broadcast %192 : f32 to vector<8x128xf32>
    %194 = arith.addf %191, %193 : vector<8x128xf32>
    %cst_36 = arith.constant 0.000000e+00 : f32
    %195 = vector.broadcast %cst_36 : f32 to vector<8x128xf32>
    %196 = arith.cmpf ogt, %194, %195 : vector<8x128xf32>
    %cst_37 = arith.constant 0.00999999977 : f32
    %197 = vector.broadcast %cst_37 : f32 to vector<8x128xf32>
    %198 = arith.mulf %197, %194 : vector<8x128xf32>
    %199 = arith.select %196, %194, %198 : vector<8x128xi1>, vector<8x128xf32>
    %c40 = arith.constant 40 : index
    %200 = memref.load %arg1[%c40] : memref<166xf32, #tpu.memory_space<smem>>
    %201 = vector.broadcast %200 : f32 to vector<8x128xf32>
    %202 = arith.mulf %201, %48 : vector<8x128xf32>
    %c41 = arith.constant 41 : index
    %203 = memref.load %arg1[%c41] : memref<166xf32, #tpu.memory_space<smem>>
    %204 = vector.broadcast %203 : f32 to vector<8x128xf32>
    %205 = arith.mulf %204, %79 : vector<8x128xf32>
    %206 = arith.addf %202, %205 : vector<8x128xf32>
    %c42 = arith.constant 42 : index
    %207 = memref.load %arg1[%c42] : memref<166xf32, #tpu.memory_space<smem>>
    %208 = vector.broadcast %207 : f32 to vector<8x128xf32>
    %209 = arith.mulf %208, %110 : vector<8x128xf32>
    %210 = arith.addf %206, %209 : vector<8x128xf32>
    %c43 = arith.constant 43 : index
    %211 = memref.load %arg1[%c43] : memref<166xf32, #tpu.memory_space<smem>>
    %212 = vector.broadcast %211 : f32 to vector<8x128xf32>
    %213 = arith.mulf %212, %141 : vector<8x128xf32>
    %214 = arith.addf %210, %213 : vector<8x128xf32>
    %c44 = arith.constant 44 : index
    %215 = memref.load %arg1[%c44] : memref<166xf32, #tpu.memory_space<smem>>
    %216 = vector.broadcast %215 : f32 to vector<8x128xf32>
    %217 = arith.mulf %216, %172 : vector<8x128xf32>
    %218 = arith.addf %214, %217 : vector<8x128xf32>
    %c56 = arith.constant 56 : index
    %219 = memref.load %arg1[%c56] : memref<166xf32, #tpu.memory_space<smem>>
    %220 = vector.broadcast %219 : f32 to vector<8x128xf32>
    %221 = arith.addf %218, %220 : vector<8x128xf32>
    %cst_38 = arith.constant 0.000000e+00 : f32
    %222 = vector.broadcast %cst_38 : f32 to vector<8x128xf32>
    %223 = arith.cmpf ogt, %221, %222 : vector<8x128xf32>
    %cst_39 = arith.constant 0.00999999977 : f32
    %224 = vector.broadcast %cst_39 : f32 to vector<8x128xf32>
    %225 = arith.mulf %224, %221 : vector<8x128xf32>
    %226 = arith.select %223, %221, %225 : vector<8x128xi1>, vector<8x128xf32>
    %c45 = arith.constant 45 : index
    %227 = memref.load %arg1[%c45] : memref<166xf32, #tpu.memory_space<smem>>
    %228 = vector.broadcast %227 : f32 to vector<8x128xf32>
    %229 = arith.mulf %228, %48 : vector<8x128xf32>
    %c46 = arith.constant 46 : index
    %230 = memref.load %arg1[%c46] : memref<166xf32, #tpu.memory_space<smem>>
    %231 = vector.broadcast %230 : f32 to vector<8x128xf32>
    %232 = arith.mulf %231, %79 : vector<8x128xf32>
    %233 = arith.addf %229, %232 : vector<8x128xf32>
    %c47 = arith.constant 47 : index
    %234 = memref.load %arg1[%c47] : memref<166xf32, #tpu.memory_space<smem>>
    %235 = vector.broadcast %234 : f32 to vector<8x128xf32>
    %236 = arith.mulf %235, %110 : vector<8x128xf32>
    %237 = arith.addf %233, %236 : vector<8x128xf32>
    %c48 = arith.constant 48 : index
    %238 = memref.load %arg1[%c48] : memref<166xf32, #tpu.memory_space<smem>>
    %239 = vector.broadcast %238 : f32 to vector<8x128xf32>
    %240 = arith.mulf %239, %141 : vector<8x128xf32>
    %241 = arith.addf %237, %240 : vector<8x128xf32>
    %c49 = arith.constant 49 : index
    %242 = memref.load %arg1[%c49] : memref<166xf32, #tpu.memory_space<smem>>
    %243 = vector.broadcast %242 : f32 to vector<8x128xf32>
    %244 = arith.mulf %243, %172 : vector<8x128xf32>
    %245 = arith.addf %241, %244 : vector<8x128xf32>
    %c57 = arith.constant 57 : index
    %246 = memref.load %arg1[%c57] : memref<166xf32, #tpu.memory_space<smem>>
    %247 = vector.broadcast %246 : f32 to vector<8x128xf32>
    %248 = arith.addf %245, %247 : vector<8x128xf32>
    %cst_40 = arith.constant 0.000000e+00 : f32
    %249 = vector.broadcast %cst_40 : f32 to vector<8x128xf32>
    %250 = arith.cmpf ogt, %248, %249 : vector<8x128xf32>
    %cst_41 = arith.constant 0.00999999977 : f32
    %251 = vector.broadcast %cst_41 : f32 to vector<8x128xf32>
    %252 = arith.mulf %251, %248 : vector<8x128xf32>
    %253 = arith.select %250, %248, %252 : vector<8x128xi1>, vector<8x128xf32>
    %c50 = arith.constant 50 : index
    %254 = memref.load %arg1[%c50] : memref<166xf32, #tpu.memory_space<smem>>
    %255 = vector.broadcast %254 : f32 to vector<8x128xf32>
    %256 = arith.mulf %255, %48 : vector<8x128xf32>
    %c51 = arith.constant 51 : index
    %257 = memref.load %arg1[%c51] : memref<166xf32, #tpu.memory_space<smem>>
    %258 = vector.broadcast %257 : f32 to vector<8x128xf32>
    %259 = arith.mulf %258, %79 : vector<8x128xf32>
    %260 = arith.addf %256, %259 : vector<8x128xf32>
    %c52 = arith.constant 52 : index
    %261 = memref.load %arg1[%c52] : memref<166xf32, #tpu.memory_space<smem>>
    %262 = vector.broadcast %261 : f32 to vector<8x128xf32>
    %263 = arith.mulf %262, %110 : vector<8x128xf32>
    %264 = arith.addf %260, %263 : vector<8x128xf32>
    %c53 = arith.constant 53 : index
    %265 = memref.load %arg1[%c53] : memref<166xf32, #tpu.memory_space<smem>>
    %266 = vector.broadcast %265 : f32 to vector<8x128xf32>
    %267 = arith.mulf %266, %141 : vector<8x128xf32>
    %268 = arith.addf %264, %267 : vector<8x128xf32>
    %c54 = arith.constant 54 : index
    %269 = memref.load %arg1[%c54] : memref<166xf32, #tpu.memory_space<smem>>
    %270 = vector.broadcast %269 : f32 to vector<8x128xf32>
    %271 = arith.mulf %270, %172 : vector<8x128xf32>
    %272 = arith.addf %268, %271 : vector<8x128xf32>
    %c58 = arith.constant 58 : index
    %273 = memref.load %arg1[%c58] : memref<166xf32, #tpu.memory_space<smem>>
    %274 = vector.broadcast %273 : f32 to vector<8x128xf32>
    %275 = arith.addf %272, %274 : vector<8x128xf32>
    %cst_42 = arith.constant 0.000000e+00 : f32
    %276 = vector.broadcast %cst_42 : f32 to vector<8x128xf32>
    %277 = arith.cmpf ogt, %275, %276 : vector<8x128xf32>
    %cst_43 = arith.constant 0.00999999977 : f32
    %278 = vector.broadcast %cst_43 : f32 to vector<8x128xf32>
    %279 = arith.mulf %278, %275 : vector<8x128xf32>
    %280 = arith.select %277, %275, %279 : vector<8x128xi1>, vector<8x128xf32>
    %c59 = arith.constant 59 : index
    %281 = memref.load %arg1[%c59] : memref<166xf32, #tpu.memory_space<smem>>
    %282 = vector.broadcast %281 : f32 to vector<8x128xf32>
    %283 = arith.mulf %282, %199 : vector<8x128xf32>
    %c60 = arith.constant 60 : index
    %284 = memref.load %arg1[%c60] : memref<166xf32, #tpu.memory_space<smem>>
    %285 = vector.broadcast %284 : f32 to vector<8x128xf32>
    %286 = arith.mulf %285, %226 : vector<8x128xf32>
    %287 = arith.addf %283, %286 : vector<8x128xf32>
    %c61 = arith.constant 61 : index
    %288 = memref.load %arg1[%c61] : memref<166xf32, #tpu.memory_space<smem>>
    %289 = vector.broadcast %288 : f32 to vector<8x128xf32>
    %290 = arith.mulf %289, %253 : vector<8x128xf32>
    %291 = arith.addf %287, %290 : vector<8x128xf32>
    %c62 = arith.constant 62 : index
    %292 = memref.load %arg1[%c62] : memref<166xf32, #tpu.memory_space<smem>>
    %293 = vector.broadcast %292 : f32 to vector<8x128xf32>
    %294 = arith.mulf %293, %280 : vector<8x128xf32>
    %295 = arith.addf %291, %294 : vector<8x128xf32>
    %c83 = arith.constant 83 : index
    %296 = memref.load %arg1[%c83] : memref<166xf32, #tpu.memory_space<smem>>
    %297 = vector.broadcast %296 : f32 to vector<8x128xf32>
    %298 = arith.addf %295, %297 : vector<8x128xf32>
    %c63 = arith.constant 63 : index
    %299 = memref.load %arg1[%c63] : memref<166xf32, #tpu.memory_space<smem>>
    %300 = vector.broadcast %299 : f32 to vector<8x128xf32>
    %301 = arith.mulf %300, %199 : vector<8x128xf32>
    %c64 = arith.constant 64 : index
    %302 = memref.load %arg1[%c64] : memref<166xf32, #tpu.memory_space<smem>>
    %303 = vector.broadcast %302 : f32 to vector<8x128xf32>
    %304 = arith.mulf %303, %226 : vector<8x128xf32>
    %305 = arith.addf %301, %304 : vector<8x128xf32>
    %c65 = arith.constant 65 : index
    %306 = memref.load %arg1[%c65] : memref<166xf32, #tpu.memory_space<smem>>
    %307 = vector.broadcast %306 : f32 to vector<8x128xf32>
    %308 = arith.mulf %307, %253 : vector<8x128xf32>
    %309 = arith.addf %305, %308 : vector<8x128xf32>
    %c66 = arith.constant 66 : index
    %310 = memref.load %arg1[%c66] : memref<166xf32, #tpu.memory_space<smem>>
    %311 = vector.broadcast %310 : f32 to vector<8x128xf32>
    %312 = arith.mulf %311, %280 : vector<8x128xf32>
    %313 = arith.addf %309, %312 : vector<8x128xf32>
    %c84 = arith.constant 84 : index
    %314 = memref.load %arg1[%c84] : memref<166xf32, #tpu.memory_space<smem>>
    %315 = vector.broadcast %314 : f32 to vector<8x128xf32>
    %316 = arith.addf %313, %315 : vector<8x128xf32>
    %c67 = arith.constant 67 : index
    %317 = memref.load %arg1[%c67] : memref<166xf32, #tpu.memory_space<smem>>
    %318 = vector.broadcast %317 : f32 to vector<8x128xf32>
    %319 = arith.mulf %318, %199 : vector<8x128xf32>
    %c68 = arith.constant 68 : index
    %320 = memref.load %arg1[%c68] : memref<166xf32, #tpu.memory_space<smem>>
    %321 = vector.broadcast %320 : f32 to vector<8x128xf32>
    %322 = arith.mulf %321, %226 : vector<8x128xf32>
    %323 = arith.addf %319, %322 : vector<8x128xf32>
    %c69 = arith.constant 69 : index
    %324 = memref.load %arg1[%c69] : memref<166xf32, #tpu.memory_space<smem>>
    %325 = vector.broadcast %324 : f32 to vector<8x128xf32>
    %326 = arith.mulf %325, %253 : vector<8x128xf32>
    %327 = arith.addf %323, %326 : vector<8x128xf32>
    %c70 = arith.constant 70 : index
    %328 = memref.load %arg1[%c70] : memref<166xf32, #tpu.memory_space<smem>>
    %329 = vector.broadcast %328 : f32 to vector<8x128xf32>
    %330 = arith.mulf %329, %280 : vector<8x128xf32>
    %331 = arith.addf %327, %330 : vector<8x128xf32>
    %c85 = arith.constant 85 : index
    %332 = memref.load %arg1[%c85] : memref<166xf32, #tpu.memory_space<smem>>
    %333 = vector.broadcast %332 : f32 to vector<8x128xf32>
    %334 = arith.addf %331, %333 : vector<8x128xf32>
    %c71 = arith.constant 71 : index
    %335 = memref.load %arg1[%c71] : memref<166xf32, #tpu.memory_space<smem>>
    %336 = vector.broadcast %335 : f32 to vector<8x128xf32>
    %337 = arith.mulf %336, %199 : vector<8x128xf32>
    %c72 = arith.constant 72 : index
    %338 = memref.load %arg1[%c72] : memref<166xf32, #tpu.memory_space<smem>>
    %339 = vector.broadcast %338 : f32 to vector<8x128xf32>
    %340 = arith.mulf %339, %226 : vector<8x128xf32>
    %341 = arith.addf %337, %340 : vector<8x128xf32>
    %c73 = arith.constant 73 : index
    %342 = memref.load %arg1[%c73] : memref<166xf32, #tpu.memory_space<smem>>
    %343 = vector.broadcast %342 : f32 to vector<8x128xf32>
    %344 = arith.mulf %343, %253 : vector<8x128xf32>
    %345 = arith.addf %341, %344 : vector<8x128xf32>
    %c74 = arith.constant 74 : index
    %346 = memref.load %arg1[%c74] : memref<166xf32, #tpu.memory_space<smem>>
    %347 = vector.broadcast %346 : f32 to vector<8x128xf32>
    %348 = arith.mulf %347, %280 : vector<8x128xf32>
    %349 = arith.addf %345, %348 : vector<8x128xf32>
    %c86 = arith.constant 86 : index
    %350 = memref.load %arg1[%c86] : memref<166xf32, #tpu.memory_space<smem>>
    %351 = vector.broadcast %350 : f32 to vector<8x128xf32>
    %352 = arith.addf %349, %351 : vector<8x128xf32>
    %c75 = arith.constant 75 : index
    %353 = memref.load %arg1[%c75] : memref<166xf32, #tpu.memory_space<smem>>
    %354 = vector.broadcast %353 : f32 to vector<8x128xf32>
    %355 = arith.mulf %354, %199 : vector<8x128xf32>
    %c76 = arith.constant 76 : index
    %356 = memref.load %arg1[%c76] : memref<166xf32, #tpu.memory_space<smem>>
    %357 = vector.broadcast %356 : f32 to vector<8x128xf32>
    %358 = arith.mulf %357, %226 : vector<8x128xf32>
    %359 = arith.addf %355, %358 : vector<8x128xf32>
    %c77 = arith.constant 77 : index
    %360 = memref.load %arg1[%c77] : memref<166xf32, #tpu.memory_space<smem>>
    %361 = vector.broadcast %360 : f32 to vector<8x128xf32>
    %362 = arith.mulf %361, %253 : vector<8x128xf32>
    %363 = arith.addf %359, %362 : vector<8x128xf32>
    %c78 = arith.constant 78 : index
    %364 = memref.load %arg1[%c78] : memref<166xf32, #tpu.memory_space<smem>>
    %365 = vector.broadcast %364 : f32 to vector<8x128xf32>
    %366 = arith.mulf %365, %280 : vector<8x128xf32>
    %367 = arith.addf %363, %366 : vector<8x128xf32>
    %c87 = arith.constant 87 : index
    %368 = memref.load %arg1[%c87] : memref<166xf32, #tpu.memory_space<smem>>
    %369 = vector.broadcast %368 : f32 to vector<8x128xf32>
    %370 = arith.addf %367, %369 : vector<8x128xf32>
    %c79 = arith.constant 79 : index
    %371 = memref.load %arg1[%c79] : memref<166xf32, #tpu.memory_space<smem>>
    %372 = vector.broadcast %371 : f32 to vector<8x128xf32>
    %373 = arith.mulf %372, %199 : vector<8x128xf32>
    %c80 = arith.constant 80 : index
    %374 = memref.load %arg1[%c80] : memref<166xf32, #tpu.memory_space<smem>>
    %375 = vector.broadcast %374 : f32 to vector<8x128xf32>
    %376 = arith.mulf %375, %226 : vector<8x128xf32>
    %377 = arith.addf %373, %376 : vector<8x128xf32>
    %c81 = arith.constant 81 : index
    %378 = memref.load %arg1[%c81] : memref<166xf32, #tpu.memory_space<smem>>
    %379 = vector.broadcast %378 : f32 to vector<8x128xf32>
    %380 = arith.mulf %379, %253 : vector<8x128xf32>
    %381 = arith.addf %377, %380 : vector<8x128xf32>
    %c82 = arith.constant 82 : index
    %382 = memref.load %arg1[%c82] : memref<166xf32, #tpu.memory_space<smem>>
    %383 = vector.broadcast %382 : f32 to vector<8x128xf32>
    %384 = arith.mulf %383, %280 : vector<8x128xf32>
    %385 = arith.addf %381, %384 : vector<8x128xf32>
    %c88 = arith.constant 88 : index
    %386 = memref.load %arg1[%c88] : memref<166xf32, #tpu.memory_space<smem>>
    %387 = vector.broadcast %386 : f32 to vector<8x128xf32>
    %388 = arith.addf %385, %387 : vector<8x128xf32>
    %cst_44 = arith.constant 5.000000e-01 : f32
    %389 = vector.broadcast %cst_44 : f32 to vector<8x128xf32>
    %390 = arith.mulf %389, %352 : vector<8x128xf32>
    %391 = math.exp %390 : vector<8x128xf32>
    %392 = arith.mulf %13, %391 : vector<8x128xf32>
    %393 = arith.addf %298, %392 : vector<8x128xf32>
    %cst_45 = arith.constant 5.000000e-01 : f32
    %394 = vector.broadcast %cst_45 : f32 to vector<8x128xf32>
    %395 = arith.mulf %394, %370 : vector<8x128xf32>
    %396 = math.exp %395 : vector<8x128xf32>
    %397 = arith.mulf %15, %396 : vector<8x128xf32>
    %398 = arith.addf %316, %397 : vector<8x128xf32>
    %cst_46 = arith.constant 5.000000e-01 : f32
    %399 = vector.broadcast %cst_46 : f32 to vector<8x128xf32>
    %400 = arith.mulf %399, %388 : vector<8x128xf32>
    %401 = math.exp %400 : vector<8x128xf32>
    %402 = arith.mulf %17, %401 : vector<8x128xf32>
    %403 = arith.addf %334, %402 : vector<8x128xf32>
    %c89 = arith.constant 89 : index
    %404 = memref.load %arg1[%c89] : memref<166xf32, #tpu.memory_space<smem>>
    %405 = vector.broadcast %404 : f32 to vector<8x128xf32>
    %406 = arith.mulf %405, %393 : vector<8x128xf32>
    %c90 = arith.constant 90 : index
    %407 = memref.load %arg1[%c90] : memref<166xf32, #tpu.memory_space<smem>>
    %408 = vector.broadcast %407 : f32 to vector<8x128xf32>
    %409 = arith.mulf %408, %398 : vector<8x128xf32>
    %410 = arith.addf %406, %409 : vector<8x128xf32>
    %c91 = arith.constant 91 : index
    %411 = memref.load %arg1[%c91] : memref<166xf32, #tpu.memory_space<smem>>
    %412 = vector.broadcast %411 : f32 to vector<8x128xf32>
    %413 = arith.mulf %412, %403 : vector<8x128xf32>
    %414 = arith.addf %410, %413 : vector<8x128xf32>
    %c101 = arith.constant 101 : index
    %415 = memref.load %arg1[%c101] : memref<166xf32, #tpu.memory_space<smem>>
    %416 = vector.broadcast %415 : f32 to vector<8x128xf32>
    %417 = arith.addf %414, %416 : vector<8x128xf32>
    %cst_47 = arith.constant 0.000000e+00 : f32
    %418 = vector.broadcast %cst_47 : f32 to vector<8x128xf32>
    %419 = arith.maximumf %417, %418 : vector<8x128xf32>
    %c92 = arith.constant 92 : index
    %420 = memref.load %arg1[%c92] : memref<166xf32, #tpu.memory_space<smem>>
    %421 = vector.broadcast %420 : f32 to vector<8x128xf32>
    %422 = arith.mulf %421, %393 : vector<8x128xf32>
    %c93 = arith.constant 93 : index
    %423 = memref.load %arg1[%c93] : memref<166xf32, #tpu.memory_space<smem>>
    %424 = vector.broadcast %423 : f32 to vector<8x128xf32>
    %425 = arith.mulf %424, %398 : vector<8x128xf32>
    %426 = arith.addf %422, %425 : vector<8x128xf32>
    %c94 = arith.constant 94 : index
    %427 = memref.load %arg1[%c94] : memref<166xf32, #tpu.memory_space<smem>>
    %428 = vector.broadcast %427 : f32 to vector<8x128xf32>
    %429 = arith.mulf %428, %403 : vector<8x128xf32>
    %430 = arith.addf %426, %429 : vector<8x128xf32>
    %c102 = arith.constant 102 : index
    %431 = memref.load %arg1[%c102] : memref<166xf32, #tpu.memory_space<smem>>
    %432 = vector.broadcast %431 : f32 to vector<8x128xf32>
    %433 = arith.addf %430, %432 : vector<8x128xf32>
    %cst_48 = arith.constant 0.000000e+00 : f32
    %434 = vector.broadcast %cst_48 : f32 to vector<8x128xf32>
    %435 = arith.maximumf %433, %434 : vector<8x128xf32>
    %c95 = arith.constant 95 : index
    %436 = memref.load %arg1[%c95] : memref<166xf32, #tpu.memory_space<smem>>
    %437 = vector.broadcast %436 : f32 to vector<8x128xf32>
    %438 = arith.mulf %437, %393 : vector<8x128xf32>
    %c96 = arith.constant 96 : index
    %439 = memref.load %arg1[%c96] : memref<166xf32, #tpu.memory_space<smem>>
    %440 = vector.broadcast %439 : f32 to vector<8x128xf32>
    %441 = arith.mulf %440, %398 : vector<8x128xf32>
    %442 = arith.addf %438, %441 : vector<8x128xf32>
    %c97 = arith.constant 97 : index
    %443 = memref.load %arg1[%c97] : memref<166xf32, #tpu.memory_space<smem>>
    %444 = vector.broadcast %443 : f32 to vector<8x128xf32>
    %445 = arith.mulf %444, %403 : vector<8x128xf32>
    %446 = arith.addf %442, %445 : vector<8x128xf32>
    %c103 = arith.constant 103 : index
    %447 = memref.load %arg1[%c103] : memref<166xf32, #tpu.memory_space<smem>>
    %448 = vector.broadcast %447 : f32 to vector<8x128xf32>
    %449 = arith.addf %446, %448 : vector<8x128xf32>
    %cst_49 = arith.constant 0.000000e+00 : f32
    %450 = vector.broadcast %cst_49 : f32 to vector<8x128xf32>
    %451 = arith.maximumf %449, %450 : vector<8x128xf32>
    %c98 = arith.constant 98 : index
    %452 = memref.load %arg1[%c98] : memref<166xf32, #tpu.memory_space<smem>>
    %453 = vector.broadcast %452 : f32 to vector<8x128xf32>
    %454 = arith.mulf %453, %393 : vector<8x128xf32>
    %c99 = arith.constant 99 : index
    %455 = memref.load %arg1[%c99] : memref<166xf32, #tpu.memory_space<smem>>
    %456 = vector.broadcast %455 : f32 to vector<8x128xf32>
    %457 = arith.mulf %456, %398 : vector<8x128xf32>
    %458 = arith.addf %454, %457 : vector<8x128xf32>
    %c100 = arith.constant 100 : index
    %459 = memref.load %arg1[%c100] : memref<166xf32, #tpu.memory_space<smem>>
    %460 = vector.broadcast %459 : f32 to vector<8x128xf32>
    %461 = arith.mulf %460, %403 : vector<8x128xf32>
    %462 = arith.addf %458, %461 : vector<8x128xf32>
    %c104 = arith.constant 104 : index
    %463 = memref.load %arg1[%c104] : memref<166xf32, #tpu.memory_space<smem>>
    %464 = vector.broadcast %463 : f32 to vector<8x128xf32>
    %465 = arith.addf %462, %464 : vector<8x128xf32>
    %cst_50 = arith.constant 0.000000e+00 : f32
    %466 = vector.broadcast %cst_50 : f32 to vector<8x128xf32>
    %467 = arith.maximumf %465, %466 : vector<8x128xf32>
    %c105 = arith.constant 105 : index
    %468 = memref.load %arg1[%c105] : memref<166xf32, #tpu.memory_space<smem>>
    %469 = vector.broadcast %468 : f32 to vector<8x128xf32>
    %470 = arith.mulf %469, %419 : vector<8x128xf32>
    %c106 = arith.constant 106 : index
    %471 = memref.load %arg1[%c106] : memref<166xf32, #tpu.memory_space<smem>>
    %472 = vector.broadcast %471 : f32 to vector<8x128xf32>
    %473 = arith.mulf %472, %435 : vector<8x128xf32>
    %474 = arith.addf %470, %473 : vector<8x128xf32>
    %c107 = arith.constant 107 : index
    %475 = memref.load %arg1[%c107] : memref<166xf32, #tpu.memory_space<smem>>
    %476 = vector.broadcast %475 : f32 to vector<8x128xf32>
    %477 = arith.mulf %476, %451 : vector<8x128xf32>
    %478 = arith.addf %474, %477 : vector<8x128xf32>
    %c108 = arith.constant 108 : index
    %479 = memref.load %arg1[%c108] : memref<166xf32, #tpu.memory_space<smem>>
    %480 = vector.broadcast %479 : f32 to vector<8x128xf32>
    %481 = arith.mulf %480, %467 : vector<8x128xf32>
    %482 = arith.addf %478, %481 : vector<8x128xf32>
    %c125 = arith.constant 125 : index
    %483 = memref.load %arg1[%c125] : memref<166xf32, #tpu.memory_space<smem>>
    %484 = vector.broadcast %483 : f32 to vector<8x128xf32>
    %485 = arith.addf %482, %484 : vector<8x128xf32>
    %cst_51 = arith.constant 0.000000e+00 : f32
    %486 = vector.broadcast %cst_51 : f32 to vector<8x128xf32>
    %487 = arith.maximumf %485, %486 : vector<8x128xf32>
    %c109 = arith.constant 109 : index
    %488 = memref.load %arg1[%c109] : memref<166xf32, #tpu.memory_space<smem>>
    %489 = vector.broadcast %488 : f32 to vector<8x128xf32>
    %490 = arith.mulf %489, %419 : vector<8x128xf32>
    %c110 = arith.constant 110 : index
    %491 = memref.load %arg1[%c110] : memref<166xf32, #tpu.memory_space<smem>>
    %492 = vector.broadcast %491 : f32 to vector<8x128xf32>
    %493 = arith.mulf %492, %435 : vector<8x128xf32>
    %494 = arith.addf %490, %493 : vector<8x128xf32>
    %c111 = arith.constant 111 : index
    %495 = memref.load %arg1[%c111] : memref<166xf32, #tpu.memory_space<smem>>
    %496 = vector.broadcast %495 : f32 to vector<8x128xf32>
    %497 = arith.mulf %496, %451 : vector<8x128xf32>
    %498 = arith.addf %494, %497 : vector<8x128xf32>
    %c112 = arith.constant 112 : index
    %499 = memref.load %arg1[%c112] : memref<166xf32, #tpu.memory_space<smem>>
    %500 = vector.broadcast %499 : f32 to vector<8x128xf32>
    %501 = arith.mulf %500, %467 : vector<8x128xf32>
    %502 = arith.addf %498, %501 : vector<8x128xf32>
    %c126 = arith.constant 126 : index
    %503 = memref.load %arg1[%c126] : memref<166xf32, #tpu.memory_space<smem>>
    %504 = vector.broadcast %503 : f32 to vector<8x128xf32>
    %505 = arith.addf %502, %504 : vector<8x128xf32>
    %cst_52 = arith.constant 0.000000e+00 : f32
    %506 = vector.broadcast %cst_52 : f32 to vector<8x128xf32>
    %507 = arith.maximumf %505, %506 : vector<8x128xf32>
    %c113 = arith.constant 113 : index
    %508 = memref.load %arg1[%c113] : memref<166xf32, #tpu.memory_space<smem>>
    %509 = vector.broadcast %508 : f32 to vector<8x128xf32>
    %510 = arith.mulf %509, %419 : vector<8x128xf32>
    %c114 = arith.constant 114 : index
    %511 = memref.load %arg1[%c114] : memref<166xf32, #tpu.memory_space<smem>>
    %512 = vector.broadcast %511 : f32 to vector<8x128xf32>
    %513 = arith.mulf %512, %435 : vector<8x128xf32>
    %514 = arith.addf %510, %513 : vector<8x128xf32>
    %c115 = arith.constant 115 : index
    %515 = memref.load %arg1[%c115] : memref<166xf32, #tpu.memory_space<smem>>
    %516 = vector.broadcast %515 : f32 to vector<8x128xf32>
    %517 = arith.mulf %516, %451 : vector<8x128xf32>
    %518 = arith.addf %514, %517 : vector<8x128xf32>
    %c116 = arith.constant 116 : index
    %519 = memref.load %arg1[%c116] : memref<166xf32, #tpu.memory_space<smem>>
    %520 = vector.broadcast %519 : f32 to vector<8x128xf32>
    %521 = arith.mulf %520, %467 : vector<8x128xf32>
    %522 = arith.addf %518, %521 : vector<8x128xf32>
    %c127 = arith.constant 127 : index
    %523 = memref.load %arg1[%c127] : memref<166xf32, #tpu.memory_space<smem>>
    %524 = vector.broadcast %523 : f32 to vector<8x128xf32>
    %525 = arith.addf %522, %524 : vector<8x128xf32>
    %cst_53 = arith.constant 0.000000e+00 : f32
    %526 = vector.broadcast %cst_53 : f32 to vector<8x128xf32>
    %527 = arith.maximumf %525, %526 : vector<8x128xf32>
    %c117 = arith.constant 117 : index
    %528 = memref.load %arg1[%c117] : memref<166xf32, #tpu.memory_space<smem>>
    %529 = vector.broadcast %528 : f32 to vector<8x128xf32>
    %530 = arith.mulf %529, %419 : vector<8x128xf32>
    %c118 = arith.constant 118 : index
    %531 = memref.load %arg1[%c118] : memref<166xf32, #tpu.memory_space<smem>>
    %532 = vector.broadcast %531 : f32 to vector<8x128xf32>
    %533 = arith.mulf %532, %435 : vector<8x128xf32>
    %534 = arith.addf %530, %533 : vector<8x128xf32>
    %c119 = arith.constant 119 : index
    %535 = memref.load %arg1[%c119] : memref<166xf32, #tpu.memory_space<smem>>
    %536 = vector.broadcast %535 : f32 to vector<8x128xf32>
    %537 = arith.mulf %536, %451 : vector<8x128xf32>
    %538 = arith.addf %534, %537 : vector<8x128xf32>
    %c120 = arith.constant 120 : index
    %539 = memref.load %arg1[%c120] : memref<166xf32, #tpu.memory_space<smem>>
    %540 = vector.broadcast %539 : f32 to vector<8x128xf32>
    %541 = arith.mulf %540, %467 : vector<8x128xf32>
    %542 = arith.addf %538, %541 : vector<8x128xf32>
    %c128 = arith.constant 128 : index
    %543 = memref.load %arg1[%c128] : memref<166xf32, #tpu.memory_space<smem>>
    %544 = vector.broadcast %543 : f32 to vector<8x128xf32>
    %545 = arith.addf %542, %544 : vector<8x128xf32>
    %cst_54 = arith.constant 0.000000e+00 : f32
    %546 = vector.broadcast %cst_54 : f32 to vector<8x128xf32>
    %547 = arith.maximumf %545, %546 : vector<8x128xf32>
    %c121 = arith.constant 121 : index
    %548 = memref.load %arg1[%c121] : memref<166xf32, #tpu.memory_space<smem>>
    %549 = vector.broadcast %548 : f32 to vector<8x128xf32>
    %550 = arith.mulf %549, %419 : vector<8x128xf32>
    %c122 = arith.constant 122 : index
    %551 = memref.load %arg1[%c122] : memref<166xf32, #tpu.memory_space<smem>>
    %552 = vector.broadcast %551 : f32 to vector<8x128xf32>
    %553 = arith.mulf %552, %435 : vector<8x128xf32>
    %554 = arith.addf %550, %553 : vector<8x128xf32>
    %c123 = arith.constant 123 : index
    %555 = memref.load %arg1[%c123] : memref<166xf32, #tpu.memory_space<smem>>
    %556 = vector.broadcast %555 : f32 to vector<8x128xf32>
    %557 = arith.mulf %556, %451 : vector<8x128xf32>
    %558 = arith.addf %554, %557 : vector<8x128xf32>
    %c124 = arith.constant 124 : index
    %559 = memref.load %arg1[%c124] : memref<166xf32, #tpu.memory_space<smem>>
    %560 = vector.broadcast %559 : f32 to vector<8x128xf32>
    %561 = arith.mulf %560, %467 : vector<8x128xf32>
    %562 = arith.addf %558, %561 : vector<8x128xf32>
    %c129 = arith.constant 129 : index
    %563 = memref.load %arg1[%c129] : memref<166xf32, #tpu.memory_space<smem>>
    %564 = vector.broadcast %563 : f32 to vector<8x128xf32>
    %565 = arith.addf %562, %564 : vector<8x128xf32>
    %cst_55 = arith.constant 0.000000e+00 : f32
    %566 = vector.broadcast %cst_55 : f32 to vector<8x128xf32>
    %567 = arith.maximumf %565, %566 : vector<8x128xf32>
    %c130 = arith.constant 130 : index
    %568 = memref.load %arg1[%c130] : memref<166xf32, #tpu.memory_space<smem>>
    %569 = vector.broadcast %568 : f32 to vector<8x128xf32>
    %570 = arith.mulf %569, %487 : vector<8x128xf32>
    %c131 = arith.constant 131 : index
    %571 = memref.load %arg1[%c131] : memref<166xf32, #tpu.memory_space<smem>>
    %572 = vector.broadcast %571 : f32 to vector<8x128xf32>
    %573 = arith.mulf %572, %507 : vector<8x128xf32>
    %574 = arith.addf %570, %573 : vector<8x128xf32>
    %c132 = arith.constant 132 : index
    %575 = memref.load %arg1[%c132] : memref<166xf32, #tpu.memory_space<smem>>
    %576 = vector.broadcast %575 : f32 to vector<8x128xf32>
    %577 = arith.mulf %576, %527 : vector<8x128xf32>
    %578 = arith.addf %574, %577 : vector<8x128xf32>
    %c133 = arith.constant 133 : index
    %579 = memref.load %arg1[%c133] : memref<166xf32, #tpu.memory_space<smem>>
    %580 = vector.broadcast %579 : f32 to vector<8x128xf32>
    %581 = arith.mulf %580, %547 : vector<8x128xf32>
    %582 = arith.addf %578, %581 : vector<8x128xf32>
    %c134 = arith.constant 134 : index
    %583 = memref.load %arg1[%c134] : memref<166xf32, #tpu.memory_space<smem>>
    %584 = vector.broadcast %583 : f32 to vector<8x128xf32>
    %585 = arith.mulf %584, %567 : vector<8x128xf32>
    %586 = arith.addf %582, %585 : vector<8x128xf32>
    %c160 = arith.constant 160 : index
    %587 = memref.load %arg1[%c160] : memref<166xf32, #tpu.memory_space<smem>>
    %588 = vector.broadcast %587 : f32 to vector<8x128xf32>
    %589 = arith.addf %586, %588 : vector<8x128xf32>
    %c135 = arith.constant 135 : index
    %590 = memref.load %arg1[%c135] : memref<166xf32, #tpu.memory_space<smem>>
    %591 = vector.broadcast %590 : f32 to vector<8x128xf32>
    %592 = arith.mulf %591, %487 : vector<8x128xf32>
    %c136 = arith.constant 136 : index
    %593 = memref.load %arg1[%c136] : memref<166xf32, #tpu.memory_space<smem>>
    %594 = vector.broadcast %593 : f32 to vector<8x128xf32>
    %595 = arith.mulf %594, %507 : vector<8x128xf32>
    %596 = arith.addf %592, %595 : vector<8x128xf32>
    %c137 = arith.constant 137 : index
    %597 = memref.load %arg1[%c137] : memref<166xf32, #tpu.memory_space<smem>>
    %598 = vector.broadcast %597 : f32 to vector<8x128xf32>
    %599 = arith.mulf %598, %527 : vector<8x128xf32>
    %600 = arith.addf %596, %599 : vector<8x128xf32>
    %c138 = arith.constant 138 : index
    %601 = memref.load %arg1[%c138] : memref<166xf32, #tpu.memory_space<smem>>
    %602 = vector.broadcast %601 : f32 to vector<8x128xf32>
    %603 = arith.mulf %602, %547 : vector<8x128xf32>
    %604 = arith.addf %600, %603 : vector<8x128xf32>
    %c139 = arith.constant 139 : index
    %605 = memref.load %arg1[%c139] : memref<166xf32, #tpu.memory_space<smem>>
    %606 = vector.broadcast %605 : f32 to vector<8x128xf32>
    %607 = arith.mulf %606, %567 : vector<8x128xf32>
    %608 = arith.addf %604, %607 : vector<8x128xf32>
    %c161 = arith.constant 161 : index
    %609 = memref.load %arg1[%c161] : memref<166xf32, #tpu.memory_space<smem>>
    %610 = vector.broadcast %609 : f32 to vector<8x128xf32>
    %611 = arith.addf %608, %610 : vector<8x128xf32>
    %c140 = arith.constant 140 : index
    %612 = memref.load %arg1[%c140] : memref<166xf32, #tpu.memory_space<smem>>
    %613 = vector.broadcast %612 : f32 to vector<8x128xf32>
    %614 = arith.mulf %613, %487 : vector<8x128xf32>
    %c141 = arith.constant 141 : index
    %615 = memref.load %arg1[%c141] : memref<166xf32, #tpu.memory_space<smem>>
    %616 = vector.broadcast %615 : f32 to vector<8x128xf32>
    %617 = arith.mulf %616, %507 : vector<8x128xf32>
    %618 = arith.addf %614, %617 : vector<8x128xf32>
    %c142 = arith.constant 142 : index
    %619 = memref.load %arg1[%c142] : memref<166xf32, #tpu.memory_space<smem>>
    %620 = vector.broadcast %619 : f32 to vector<8x128xf32>
    %621 = arith.mulf %620, %527 : vector<8x128xf32>
    %622 = arith.addf %618, %621 : vector<8x128xf32>
    %c143 = arith.constant 143 : index
    %623 = memref.load %arg1[%c143] : memref<166xf32, #tpu.memory_space<smem>>
    %624 = vector.broadcast %623 : f32 to vector<8x128xf32>
    %625 = arith.mulf %624, %547 : vector<8x128xf32>
    %626 = arith.addf %622, %625 : vector<8x128xf32>
    %c144 = arith.constant 144 : index
    %627 = memref.load %arg1[%c144] : memref<166xf32, #tpu.memory_space<smem>>
    %628 = vector.broadcast %627 : f32 to vector<8x128xf32>
    %629 = arith.mulf %628, %567 : vector<8x128xf32>
    %630 = arith.addf %626, %629 : vector<8x128xf32>
    %c162 = arith.constant 162 : index
    %631 = memref.load %arg1[%c162] : memref<166xf32, #tpu.memory_space<smem>>
    %632 = vector.broadcast %631 : f32 to vector<8x128xf32>
    %633 = arith.addf %630, %632 : vector<8x128xf32>
    %c145 = arith.constant 145 : index
    %634 = memref.load %arg1[%c145] : memref<166xf32, #tpu.memory_space<smem>>
    %635 = vector.broadcast %634 : f32 to vector<8x128xf32>
    %636 = arith.mulf %635, %487 : vector<8x128xf32>
    %c146 = arith.constant 146 : index
    %637 = memref.load %arg1[%c146] : memref<166xf32, #tpu.memory_space<smem>>
    %638 = vector.broadcast %637 : f32 to vector<8x128xf32>
    %639 = arith.mulf %638, %507 : vector<8x128xf32>
    %640 = arith.addf %636, %639 : vector<8x128xf32>
    %c147 = arith.constant 147 : index
    %641 = memref.load %arg1[%c147] : memref<166xf32, #tpu.memory_space<smem>>
    %642 = vector.broadcast %641 : f32 to vector<8x128xf32>
    %643 = arith.mulf %642, %527 : vector<8x128xf32>
    %644 = arith.addf %640, %643 : vector<8x128xf32>
    %c148 = arith.constant 148 : index
    %645 = memref.load %arg1[%c148] : memref<166xf32, #tpu.memory_space<smem>>
    %646 = vector.broadcast %645 : f32 to vector<8x128xf32>
    %647 = arith.mulf %646, %547 : vector<8x128xf32>
    %648 = arith.addf %644, %647 : vector<8x128xf32>
    %c149 = arith.constant 149 : index
    %649 = memref.load %arg1[%c149] : memref<166xf32, #tpu.memory_space<smem>>
    %650 = vector.broadcast %649 : f32 to vector<8x128xf32>
    %651 = arith.mulf %650, %567 : vector<8x128xf32>
    %652 = arith.addf %648, %651 : vector<8x128xf32>
    %c163 = arith.constant 163 : index
    %653 = memref.load %arg1[%c163] : memref<166xf32, #tpu.memory_space<smem>>
    %654 = vector.broadcast %653 : f32 to vector<8x128xf32>
    %655 = arith.addf %652, %654 : vector<8x128xf32>
    %c150 = arith.constant 150 : index
    %656 = memref.load %arg1[%c150] : memref<166xf32, #tpu.memory_space<smem>>
    %657 = vector.broadcast %656 : f32 to vector<8x128xf32>
    %658 = arith.mulf %657, %487 : vector<8x128xf32>
    %c151 = arith.constant 151 : index
    %659 = memref.load %arg1[%c151] : memref<166xf32, #tpu.memory_space<smem>>
    %660 = vector.broadcast %659 : f32 to vector<8x128xf32>
    %661 = arith.mulf %660, %507 : vector<8x128xf32>
    %662 = arith.addf %658, %661 : vector<8x128xf32>
    %c152 = arith.constant 152 : index
    %663 = memref.load %arg1[%c152] : memref<166xf32, #tpu.memory_space<smem>>
    %664 = vector.broadcast %663 : f32 to vector<8x128xf32>
    %665 = arith.mulf %664, %527 : vector<8x128xf32>
    %666 = arith.addf %662, %665 : vector<8x128xf32>
    %c153 = arith.constant 153 : index
    %667 = memref.load %arg1[%c153] : memref<166xf32, #tpu.memory_space<smem>>
    %668 = vector.broadcast %667 : f32 to vector<8x128xf32>
    %669 = arith.mulf %668, %547 : vector<8x128xf32>
    %670 = arith.addf %666, %669 : vector<8x128xf32>
    %c154 = arith.constant 154 : index
    %671 = memref.load %arg1[%c154] : memref<166xf32, #tpu.memory_space<smem>>
    %672 = vector.broadcast %671 : f32 to vector<8x128xf32>
    %673 = arith.mulf %672, %567 : vector<8x128xf32>
    %674 = arith.addf %670, %673 : vector<8x128xf32>
    %c164 = arith.constant 164 : index
    %675 = memref.load %arg1[%c164] : memref<166xf32, #tpu.memory_space<smem>>
    %676 = vector.broadcast %675 : f32 to vector<8x128xf32>
    %677 = arith.addf %674, %676 : vector<8x128xf32>
    %c155 = arith.constant 155 : index
    %678 = memref.load %arg1[%c155] : memref<166xf32, #tpu.memory_space<smem>>
    %679 = vector.broadcast %678 : f32 to vector<8x128xf32>
    %680 = arith.mulf %679, %487 : vector<8x128xf32>
    %c156 = arith.constant 156 : index
    %681 = memref.load %arg1[%c156] : memref<166xf32, #tpu.memory_space<smem>>
    %682 = vector.broadcast %681 : f32 to vector<8x128xf32>
    %683 = arith.mulf %682, %507 : vector<8x128xf32>
    %684 = arith.addf %680, %683 : vector<8x128xf32>
    %c157 = arith.constant 157 : index
    %685 = memref.load %arg1[%c157] : memref<166xf32, #tpu.memory_space<smem>>
    %686 = vector.broadcast %685 : f32 to vector<8x128xf32>
    %687 = arith.mulf %686, %527 : vector<8x128xf32>
    %688 = arith.addf %684, %687 : vector<8x128xf32>
    %c158 = arith.constant 158 : index
    %689 = memref.load %arg1[%c158] : memref<166xf32, #tpu.memory_space<smem>>
    %690 = vector.broadcast %689 : f32 to vector<8x128xf32>
    %691 = arith.mulf %690, %547 : vector<8x128xf32>
    %692 = arith.addf %688, %691 : vector<8x128xf32>
    %c159 = arith.constant 159 : index
    %693 = memref.load %arg1[%c159] : memref<166xf32, #tpu.memory_space<smem>>
    %694 = vector.broadcast %693 : f32 to vector<8x128xf32>
    %695 = arith.mulf %694, %567 : vector<8x128xf32>
    %696 = arith.addf %692, %695 : vector<8x128xf32>
    %c165 = arith.constant 165 : index
    %697 = memref.load %arg1[%c165] : memref<166xf32, #tpu.memory_space<smem>>
    %698 = vector.broadcast %697 : f32 to vector<8x128xf32>
    %699 = arith.addf %696, %698 : vector<8x128xf32>
    %c0_56 = arith.constant 0 : index
    %c0_57 = arith.constant 0 : index
    %c0_58 = arith.constant 0 : index
    %700 = vector.load %arg4[%c0_56, %c0_57, %c0_58] : memref<15x8x128xf32, #tpu.memory_space<vmem>>, vector<1x8x128xf32>
    %701 = vector.shape_cast %700 : vector<1x8x128xf32> to vector<8x128xf32>
    %702 = vector.shape_cast %393 : vector<8x128xf32> to vector<1x8x128xf32>
    tpu.vector_store %arg4[%c0_56, %c0_57, %c0_58], %702 {strides = array<i32>} : memref<15x8x128xf32, #tpu.memory_space<vmem>>, vector<1x8x128xf32>,
    %c1_59 = arith.constant 1 : index
    %c0_60 = arith.constant 0 : index
    %c0_61 = arith.constant 0 : index
    %703 = vector.load %arg4[%c1_59, %c0_60, %c0_61] : memref<15x8x128xf32, #tpu.memory_space<vmem>>, vector<1x8x128xf32>
    %704 = vector.shape_cast %703 : vector<1x8x128xf32> to vector<8x128xf32>
    %705 = vector.shape_cast %398 : vector<8x128xf32> to vector<1x8x128xf32>
    tpu.vector_store %arg4[%c1_59, %c0_60, %c0_61], %705 {strides = array<i32>} : memref<15x8x128xf32, #tpu.memory_space<vmem>>, vector<1x8x128xf32>,
    %c2_62 = arith.constant 2 : index
    %c0_63 = arith.constant 0 : index
    %c0_64 = arith.constant 0 : index
    %706 = vector.load %arg4[%c2_62, %c0_63, %c0_64] : memref<15x8x128xf32, #tpu.memory_space<vmem>>, vector<1x8x128xf32>
    %707 = vector.shape_cast %706 : vector<1x8x128xf32> to vector<8x128xf32>
    %708 = vector.shape_cast %403 : vector<8x128xf32> to vector<1x8x128xf32>
    tpu.vector_store %arg4[%c2_62, %c0_63, %c0_64], %708 {strides = array<i32>} : memref<15x8x128xf32, #tpu.memory_space<vmem>>, vector<1x8x128xf32>,
    %c3_65 = arith.constant 3 : index
    %c0_66 = arith.constant 0 : index
    %c0_67 = arith.constant 0 : index
    %709 = vector.load %arg4[%c3_65, %c0_66, %c0_67] : memref<15x8x128xf32, #tpu.memory_space<vmem>>, vector<1x8x128xf32>
    %710 = vector.shape_cast %709 : vector<1x8x128xf32> to vector<8x128xf32>
    %711 = vector.shape_cast %298 : vector<8x128xf32> to vector<1x8x128xf32>
    tpu.vector_store %arg4[%c3_65, %c0_66, %c0_67], %711 {strides = array<i32>} : memref<15x8x128xf32, #tpu.memory_space<vmem>>, vector<1x8x128xf32>,
    %c4_68 = arith.constant 4 : index
    %c0_69 = arith.constant 0 : index
    %c0_70 = arith.constant 0 : index
    %712 = vector.load %arg4[%c4_68, %c0_69, %c0_70] : memref<15x8x128xf32, #tpu.memory_space<vmem>>, vector<1x8x128xf32>
    %713 = vector.shape_cast %712 : vector<1x8x128xf32> to vector<8x128xf32>
    %714 = vector.shape_cast %316 : vector<8x128xf32> to vector<1x8x128xf32>
    tpu.vector_store %arg4[%c4_68, %c0_69, %c0_70], %714 {strides = array<i32>} : memref<15x8x128xf32, #tpu.memory_space<vmem>>, vector<1x8x128xf32>,
    %c5_71 = arith.constant 5 : index
    %c0_72 = arith.constant 0 : index
    %c0_73 = arith.constant 0 : index
    %715 = vector.load %arg4[%c5_71, %c0_72, %c0_73] : memref<15x8x128xf32, #tpu.memory_space<vmem>>, vector<1x8x128xf32>
    %716 = vector.shape_cast %715 : vector<1x8x128xf32> to vector<8x128xf32>
    %717 = vector.shape_cast %334 : vector<8x128xf32> to vector<1x8x128xf32>
    tpu.vector_store %arg4[%c5_71, %c0_72, %c0_73], %717 {strides = array<i32>} : memref<15x8x128xf32, #tpu.memory_space<vmem>>, vector<1x8x128xf32>,
    %c6_74 = arith.constant 6 : index
    %c0_75 = arith.constant 0 : index
    %c0_76 = arith.constant 0 : index
    %718 = vector.load %arg4[%c6_74, %c0_75, %c0_76] : memref<15x8x128xf32, #tpu.memory_space<vmem>>, vector<1x8x128xf32>
    %719 = vector.shape_cast %718 : vector<1x8x128xf32> to vector<8x128xf32>
    %720 = vector.shape_cast %352 : vector<8x128xf32> to vector<1x8x128xf32>
    tpu.vector_store %arg4[%c6_74, %c0_75, %c0_76], %720 {strides = array<i32>} : memref<15x8x128xf32, #tpu.memory_space<vmem>>, vector<1x8x128xf32>,
    %c7_77 = arith.constant 7 : index
    %c0_78 = arith.constant 0 : index
    %c0_79 = arith.constant 0 : index
    %721 = vector.load %arg4[%c7_77, %c0_78, %c0_79] : memref<15x8x128xf32, #tpu.memory_space<vmem>>, vector<1x8x128xf32>
    %722 = vector.shape_cast %721 : vector<1x8x128xf32> to vector<8x128xf32>
    %723 = vector.shape_cast %370 : vector<8x128xf32> to vector<1x8x128xf32>
    tpu.vector_store %arg4[%c7_77, %c0_78, %c0_79], %723 {strides = array<i32>} : memref<15x8x128xf32, #tpu.memory_space<vmem>>, vector<1x8x128xf32>,
    %c8_80 = arith.constant 8 : index
    %c0_81 = arith.constant 0 : index
    %c0_82 = arith.constant 0 : index
    %724 = vector.load %arg4[%c8_80, %c0_81, %c0_82] : memref<15x8x128xf32, #tpu.memory_space<vmem>>, vector<1x8x128xf32>
    %725 = vector.shape_cast %724 : vector<1x8x128xf32> to vector<8x128xf32>
    %726 = vector.shape_cast %388 : vector<8x128xf32> to vector<1x8x128xf32>
    tpu.vector_store %arg4[%c8_80, %c0_81, %c0_82], %726 {strides = array<i32>} : memref<15x8x128xf32, #tpu.memory_space<vmem>>, vector<1x8x128xf32>,
    %c9_83 = arith.constant 9 : index
    %c0_84 = arith.constant 0 : index
    %c0_85 = arith.constant 0 : index
    %727 = vector.load %arg4[%c9_83, %c0_84, %c0_85] : memref<15x8x128xf32, #tpu.memory_space<vmem>>, vector<1x8x128xf32>
    %728 = vector.shape_cast %727 : vector<1x8x128xf32> to vector<8x128xf32>
    %729 = vector.shape_cast %589 : vector<8x128xf32> to vector<1x8x128xf32>
    tpu.vector_store %arg4[%c9_83, %c0_84, %c0_85], %729 {strides = array<i32>} : memref<15x8x128xf32, #tpu.memory_space<vmem>>, vector<1x8x128xf32>,
    %c10_86 = arith.constant 10 : index
    %c0_87 = arith.constant 0 : index
    %c0_88 = arith.constant 0 : index
    %730 = vector.load %arg4[%c10_86, %c0_87, %c0_88] : memref<15x8x128xf32, #tpu.memory_space<vmem>>, vector<1x8x128xf32>
    %731 = vector.shape_cast %730 : vector<1x8x128xf32> to vector<8x128xf32>
    %732 = vector.shape_cast %611 : vector<8x128xf32> to vector<1x8x128xf32>
    tpu.vector_store %arg4[%c10_86, %c0_87, %c0_88], %732 {strides = array<i32>} : memref<15x8x128xf32, #tpu.memory_space<vmem>>, vector<1x8x128xf32>,
    %c11_89 = arith.constant 11 : index
    %c0_90 = arith.constant 0 : index
    %c0_91 = arith.constant 0 : index
    %733 = vector.load %arg4[%c11_89, %c0_90, %c0_91] : memref<15x8x128xf32, #tpu.memory_space<vmem>>, vector<1x8x128xf32>
    %734 = vector.shape_cast %733 : vector<1x8x128xf32> to vector<8x128xf32>
    %735 = vector.shape_cast %633 : vector<8x128xf32> to vector<1x8x128xf32>
    tpu.vector_store %arg4[%c11_89, %c0_90, %c0_91], %735 {strides = array<i32>} : memref<15x8x128xf32, #tpu.memory_space<vmem>>, vector<1x8x128xf32>,
    %c12_92 = arith.constant 12 : index
    %c0_93 = arith.constant 0 : index
    %c0_94 = arith.constant 0 : index
    %736 = vector.load %arg4[%c12_92, %c0_93, %c0_94] : memref<15x8x128xf32, #tpu.memory_space<vmem>>, vector<1x8x128xf32>
    %737 = vector.shape_cast %736 : vector<1x8x128xf32> to vector<8x128xf32>
    %738 = vector.shape_cast %655 : vector<8x128xf32> to vector<1x8x128xf32>
    tpu.vector_store %arg4[%c12_92, %c0_93, %c0_94], %738 {strides = array<i32>} : memref<15x8x128xf32, #tpu.memory_space<vmem>>, vector<1x8x128xf32>,
    %c13_95 = arith.constant 13 : index
    %c0_96 = arith.constant 0 : index
    %c0_97 = arith.constant 0 : index
    %739 = vector.load %arg4[%c13_95, %c0_96, %c0_97] : memref<15x8x128xf32, #tpu.memory_space<vmem>>, vector<1x8x128xf32>
    %740 = vector.shape_cast %739 : vector<1x8x128xf32> to vector<8x128xf32>
    %741 = vector.shape_cast %677 : vector<8x128xf32> to vector<1x8x128xf32>
    tpu.vector_store %arg4[%c13_95, %c0_96, %c0_97], %741 {strides = array<i32>} : memref<15x8x128xf32, #tpu.memory_space<vmem>>, vector<1x8x128xf32>,
    %c14_98 = arith.constant 14 : index
    %c0_99 = arith.constant 0 : index
    %c0_100 = arith.constant 0 : index
    %742 = vector.load %arg4[%c14_98, %c0_99, %c0_100] : memref<15x8x128xf32, #tpu.memory_space<vmem>>, vector<1x8x128xf32>
    %743 = vector.shape_cast %742 : vector<1x8x128xf32> to vector<8x128xf32>
    %744 = vector.shape_cast %699 : vector<8x128xf32> to vector<1x8x128xf32>
    tpu.vector_store %arg4[%c14_98, %c0_99, %c0_100], %744 {strides = array<i32>} : memref<15x8x128xf32, #tpu.memory_space<vmem>>, vector<1x8x128xf32>,
    return
  }
  func.func @transform_0(%arg0: i32, %arg1: memref<166xf32, #tpu.memory_space<smem>>) -> (i32, i32, i32) {
    %c0_i32 = arith.constant 0 : i32
    %c0_i32_0 = arith.constant 0 : i32
    %c0_i32_1 = arith.constant 0 : i32
    return %c0_i32, %arg0, %c0_i32_0 : i32, i32, i32
  }
  func.func @transform_1(%arg0: i32, %arg1: memref<166xf32, #tpu.memory_space<smem>>) -> (i32, i32, i32) {
    %c0_i32 = arith.constant 0 : i32
    %c0_i32_0 = arith.constant 0 : i32
    %c0_i32_1 = arith.constant 0 : i32
    return %c0_i32, %arg0, %c0_i32_0 : i32, i32, i32
  }
  func.func @transform_2(%arg0: i32, %arg1: memref<166xf32, #tpu.memory_space<smem>>) -> (i32, i32, i32) {
    %c0_i32 = arith.constant 0 : i32
    %c0_i32_0 = arith.constant 0 : i32
    %c0_i32_1 = arith.constant 0 : i32
    return %c0_i32, %arg0, %c0_i32_0 : i32, i32, i32
  }
}

</mosaic_0001>

<bundles_post_ra>
// kernel: vae_linear_0103_forward.1
= control target key start
LH: loop header
LB: loop body
LE: loop exit
PB: predicated region body
PF: predicated region fallthrough
CT: control target
= control target key end

     0   :  { %s1548_s0 = inlined_call_operand.vmem [shape: f32[166], index: 0, kind: input, shape index: {}]   ;;  %s1549_s1 = inlined_call_operand.vmem [shape: f32[6,8,128], index: 1, kind: input, shape index: {}]   ;;  %s1550_s2 = inlined_call_operand.vmem [shape: f32[3,8,128], index: 2, kind: input, shape index: {}]   ;;  %s1551_s3 = inlined_call_operand.vmem [shape: f32[15,8,128], index: 3, kind: output, shape index: {}]  }
   0x1   :  { %s8_s14 = sshll.u32 %s1548_s0, 4  ;;  %s9_s14 = int_to_ptr.vmem [resolvable:$true] %s8_s14 }
   0x2   :  { %s915_s15 = scalar_lea.vmem %s9_s14, 32  ;;  %p920_p1 = scmp.lt.s32.totalorder %s9_s14, %s9_s14 }
   0x3   :  { %p916_p0 = scmp.ne.s32.totalorder %s9_s14, %s915_s15  ;;  %p921_p2 = scmp.lt.s32.totalorder %s915_s15, %s915_s15 }
   0x5   :  { %p922_p3 = por %p921_p2, %p920_p1 }
   0x7   :  { %p923_p4 = pnand %p922_p3, %p916_p0 }
   0x9   :  { %926 = shalt.err (!%p923_p4)  }
   0xa   :  { %s929_s16 = smov [#allocation3]  }
   0xb   :  { %11 = dma.vmem_to_smem %s9_s14, 32, %s929_s16, [#allocation2] }
   0xc   :  { %927 = dma.done.wait [#allocation2], 32 }
   0xd   :  { %928 = vsyncadd [#allocation2], 4294967264 }
   0xe   :  { %13 = sfence }
   0xf   :  { %s34_s17 = sld [smem:[#allocation3]]  ;;  %v956_v0 = vld [vmem:[%s1549_s1] sm:$0xff]  ;;  %v963_v1 = vld [vmem:[%s1549_s1 + $0x8] sm:$0xff]  ;;  %v970_v2 = vld [vmem:[%s1549_s1 + $0x10] sm:$0xff] }
  0x10   :  { %s729_s18 = sld [smem:[#allocation3 + $0x1]]  ;;  %v980_v9 = vld [vmem:[%s1549_s1 + $0x18] sm:$0xff]  ;;  %v987_v12 = vld [vmem:[%s1549_s1 + $0x20] sm:$0xff]  ;;  %v1001_v25 = vld [vmem:[%s1549_s1 + $0x28] sm:$0xff] }
  0x11   :  { %s730_s19 = sld [smem:[#allocation3 + $0x2]] }
  0x12   :  { %s731_s20 = sld [smem:[#allocation3 + $0x3]] }
  0x13   :  { %s958_s0 = sld [smem:[#allocation3 + $0x4]] }
  0x14   :  { %s965_s25 = sld [smem:[#allocation3 + $0x5]] }
  0x15   :  { %v35_v3 = vstv %s34_s17  ;;  %s972_s28 = sld [smem:[#allocation3 + $0x1e]] }
  0x16   :  { %v36_v4 = vmul.f32 %v35_v3, %v956_v0  ;;  %v38_v5 = vstv %s729_s18  ;;  %s735_s29 = sld [smem:[#allocation3 + $0x6]] }
  0x17   :  { %v39_v6 = vmul.f32 %v963_v1, %v38_v5  ;;  %v42_v7 = vstv %s730_s19  ;;  %s736_s30 = sld [smem:[#allocation3 + $0x7]] }
  0x18   :  { %v43_v8 = vmul.f32 %v970_v2, %v42_v7  ;;  %s737_s4 = sld [smem:[#allocation3 + $0x8]]  ;;  %v46_v11 = vstv %s731_s20 }
  0x19   :  { %v40_v10 = vadd.f32 %v39_v6, %v36_v4  ;;  %s738_s7 = sld [smem:[#allocation3 + $0x9]]  ;;  %v47_v14 = vmul.f32 %v980_v9, %v46_v11  ;;  %v50_v15 = vstv %s958_s0 }
  0x1a   :  { %s739_s8 = sld [smem:[#allocation3 + $0xa]]  ;;  %v51_v21 = vmul.f32 %v987_v12, %v50_v15  ;;  %v54_v22 = vstv %s965_s25 }
  0x1b   :  { %s982_s9 = sld [smem:[#allocation3 + $0xb]]  ;;  %v44_v13 = vadd.f32 %v43_v8, %v40_v10  ;;  %v55_v33 = vmul.f32 %v1001_v25, %v54_v22  ;;  %v58_v50 = vstv %s972_s28 }
  0x1c   :  { %v64_v16 = vstv %s735_s29  ;;  %s991_s12 = sld [smem:[#allocation3 + $0x1f]] }
  0x1d   :  { %v65_v17 = vmul.f32 %v64_v16, %v956_v0  ;;  %v67_v18 = vstv %s736_s30  ;;  %s742_s13 = sld [smem:[#allocation3 + $0xc]]  ;;  %v48_v26 = vadd.f32 %v47_v14, %v44_v13 }
  0x1e   :  { %v68_v19 = vmul.f32 %v963_v1, %v67_v18  ;;  %v71_v20 = vstv %s737_s4  ;;  %s743_s14 = sld [smem:[#allocation3 + $0xd]] }
  0x1f   :  { %v72_v23 = vmul.f32 %v970_v2, %v71_v20  ;;  %v75_v24 = vstv %s738_s7  ;;  %s744_s15 = sld [smem:[#allocation3 + $0xe]]  ;;  %v52_v35 = vadd.f32 %v51_v21, %v48_v26 }
  0x20   :  { %v69_v27 = vadd.f32 %v68_v19, %v65_v17  ;;  %v76_v28 = vmul.f32 %v980_v9, %v75_v24  ;;  %v79_v29 = vstv %s739_s8  ;;  %s745_s18 = sld [smem:[#allocation3 + $0xf]] }
  0x21   :  { %s1004_s19 = sld [smem:[#allocation3 + $0x10]]  ;;  %v80_v31 = vmul.f32 %v987_v12, %v79_v29  ;;  %v83_v32 = vstv %s982_s9  ;;  %v56_v48 = vadd.f32 %v55_v33, %v52_v35 }
  0x22   :  { %v73_v30 = vadd.f32 %v72_v23, %v69_v27  ;;  %s1008_s20 = sld [smem:[#allocation3 + $0x11]]  ;;  %v84_v39 = vmul.f32 %v1001_v25, %v83_v32  ;;  %v87_v54 = vstv %s991_s12 }
  0x23   :  { %v93_v34 = vstv %s742_s13  ;;  %s1011_s21 = sld [smem:[#allocation3 + $0x20]]  ;;  %v59_v60 = vadd.f32 %v58_v50, %v56_v48 }
  0x24   :  { %v77_v36 = vadd.f32 %v76_v28, %v73_v30  ;;  %v94_v37 = vmul.f32 %v93_v34, %v956_v0  ;;  %v96_v38 = vstv %s743_s14  ;;  %s749_s1 = sld [smem:[#allocation3 + $0x12]] }
  0x25   :  { %v97_v40 = vmul.f32 %v963_v1, %v96_v38  ;;  %v100_v41 = vstv %s744_s15  ;;  %s750_s22 = sld [smem:[#allocation3 + $0x13]]  ;;  %vm60_vm0 = vcmp.gt.f32.partialorder %v59_v60, 0.0  ;;  %v61_v16 = vmul.f32 0.01, %v59_v60 }
  0x26   :  { %v81_v42 = vadd.f32 %v80_v31, %v77_v36  ;;  %v101_v43 = vmul.f32 %v970_v2, %v100_v41  ;;  %v104_v44 = vstv %s745_s18  ;;  %s751_s0 = sld [smem:[#allocation3 + $0x14]] }
  0x27   :  { %v98_v45 = vadd.f32 %v97_v40, %v94_v37  ;;  %v105_v46 = vmul.f32 %v980_v9, %v104_v44  ;;  %v108_v47 = vstv %s1004_s19  ;;  %s752_s23 = sld [smem:[#allocation3 + $0x15]]  ;;  %v1057_v34 = vsel %vm60_vm0, %v59_v60, %v61_v16 }
  0x28   :  { %v112_v49 = vstv %s1008_s20  ;;  %s1020_s24 = sld [smem:[#allocation3 + $0x16]]  ;;  %v85_v51 = vadd.f32 %v84_v39, %v81_v42  ;;  %v109_v53 = vmul.f32 %v987_v12, %v108_v47 }
  0x29   :  { %v102_v52 = vadd.f32 %v101_v43, %v98_v45  ;;  %s1024_s25 = sld [smem:[#allocation3 + $0x17]]  ;;  %v113_v57 = vmul.f32 %v1001_v25, %v112_v49  ;;  %v116_v6 = vstv %s1011_s21 }
  0x2a   :  { %v122_v55 = vstv %s749_s1  ;;  %s1027_s26 = sld [smem:[#allocation3 + $0x21]]  ;;  %v88_v63 = vadd.f32 %v87_v54, %v85_v51 }
  0x2b   :  { %v106_v56 = vadd.f32 %v105_v46, %v102_v52  ;;  %v123_v58 = vmul.f32 %v122_v55, %v956_v0  ;;  %v125_v59 = vstv %s750_s22  ;;  %s756_s27 = sld [smem:[#allocation3 + $0x18]] }
  0x2c   :  { %v126_v61 = vmul.f32 %v963_v1, %v125_v59  ;;  %v129_v62 = vstv %s751_s0  ;;  %s1032_s28 = sld [smem:[#allocation3 + $0x19]]  ;;  %vm89_vm1 = vcmp.gt.f32.partialorder %v88_v63, 0.0  ;;  %v90_v23 = vmul.f32 0.01, %v88_v63 }
  0x2d   :  { %v110_v3 = vadd.f32 %v109_v53, %v106_v56  ;;  %v130_v4 = vmul.f32 %v970_v2, %v129_v62  ;;  %v133_v5 = vstv %s752_s23  ;;  %s758_s29 = sld [smem:[#allocation3 + $0x1a]] }
  0x2e   :  { %v127_v7 = vadd.f32 %v126_v61, %v123_v58  ;;  %v134_v8 = vmul.f32 %v980_v9, %v133_v5  ;;  %v137_v10 = vstv %s1020_s24  ;;  %s759_s30 = sld [smem:[#allocation3 + $0x1b]]  ;;  %v1063_v36 = vsel %vm89_vm1, %v88_v63, %v90_v23 }
  0x2f   :  { %v114_v11 = vadd.f32 %v113_v57, %v110_v3  ;;  %v141_v13 = vstv %s1024_s25  ;;  %s1039_s4 = sld [smem:[#allocation3 + $0x1c]]  ;;  %v138_v15 = vmul.f32 %v987_v12, %v137_v10 }
  0x30   :  { %v131_v14 = vadd.f32 %v130_v4, %v127_v7  ;;  %s1042_s5 = sld [smem:[#allocation3 + $0x1d]]  ;;  %v142_v20 = vmul.f32 %v1001_v25, %v141_v13  ;;  %v145_v24 = vstv %s1027_s26 }
  0x31   :  { %v117_v17 = vadd.f32 %v116_v6, %v114_v11  ;;  %v151_v18 = vstv %s756_s27  ;;  %s1044_s6 = sld [smem:[#allocation3 + $0x22]] }
  0x32   :  { %v135_v19 = vadd.f32 %v134_v8, %v131_v14  ;;  %v152_v21 = vmul.f32 %v151_v18, %v956_v0  ;;  %v154_v22 = vstv %s1032_s28  ;;  %s763_s7 = sld [smem:[#allocation3 + $0x23]] }
  0x33   :  { %v155_v26 = vmul.f32 %v963_v1, %v154_v22  ;;  %v158_v27 = vstv %s758_s29  ;;  %s764_s8 = sld [smem:[#allocation3 + $0x24]]  ;;  %v119_v28 = vmul.f32 0.01, %v117_v17  ;;  %vm118_vm2 = vcmp.gt.f32.partialorder %v117_v17, 0.0 }
  0x34   :  { %v139_v29 = vadd.f32 %v138_v15, %v135_v19  ;;  %v159_v30 = vmul.f32 %v970_v2, %v158_v27  ;;  %v162_v31 = vstv %s759_s30  ;;  %s765_s9 = sld [smem:[#allocation3 + $0x25]] }
  0x35   :  { %v156_v32 = vadd.f32 %v155_v26, %v152_v21  ;;  %v163_v0 = vmul.f32 %v980_v9, %v162_v31  ;;  %v166_v33 = vstv %s1039_s4  ;;  %s1054_s10 = sld [smem:[#allocation3 + $0x26]]  ;;  %v1068_v38 = vsel %vm118_vm2, %v117_v17, %v119_v28 }
  0x36   :  { %v143_v35 = vadd.f32 %v142_v20, %v139_v29  ;;  %v170_v1 = vstv %s1042_s5  ;;  %s1060_s11 = sld [smem:[#allocation3 + $0x27]]  ;;  %v167_v37 = vmul.f32 %v987_v12, %v166_v33 }
  0x37   :  { %v160_v2 = vadd.f32 %v159_v30, %v156_v32  ;;  %s1066_s12 = sld [smem:[#allocation3 + $0x37]]  ;;  %v171_v41 = vmul.f32 %v1001_v25, %v170_v1  ;;  %v174_v50 = vstv %s1044_s6 }
  0x38   :  { %v146_v9 = vadd.f32 %v145_v24, %v143_v35  ;;  %v180_v39 = vstv %s763_s7  ;;  %s769_s13 = sld [smem:[#allocation3 + $0x28]] }
  0x39   :  { %v164_v40 = vadd.f32 %v163_v0, %v160_v2  ;;  %v181_v42 = vmul.f32 %v180_v39, %v1057_v34  ;;  %v183_v43 = vstv %s764_s8  ;;  %s770_s14 = sld [smem:[#allocation3 + $0x29]] }
  0x3a   :  { %vm147_vm3 = vcmp.gt.f32.partialorder %v146_v9, 0.0  ;;  %v148_v44 = vmul.f32 0.01, %v146_v9  ;;  %v184_v12 = vmul.f32 %v183_v43, %v1063_v36  ;;  %v187_v45 = vstv %s765_s9  ;;  %s771_s15 = sld [smem:[#allocation3 + $0x2a]] }
  0x3b   :  { %v168_v46 = vadd.f32 %v167_v37, %v164_v40  ;;  %v188_v47 = vmul.f32 %v187_v45, %v1068_v38  ;;  %v191_v48 = vstv %s1054_s10  ;;  %s772_s16 = sld [smem:[#allocation3 + $0x2b]] }
  0x3c   :  { %v1075_v49 = vsel %vm147_vm3, %v146_v9, %v148_v44  ;;  %v185_v25 = vadd.f32 %v184_v12, %v181_v42  ;;  %s773_s17 = sld [smem:[#allocation3 + $0x2c]]  ;;  %v195_v58 = vstv %s1060_s11 }
  0x3d   :  { %v172_v51 = vadd.f32 %v171_v41, %v168_v46  ;;  %s1078_s18 = sld [smem:[#allocation3 + $0x38]]  ;;  %v192_v53 = vmul.f32 %v191_v48, %v1075_v49  ;;  %v199_v14 = vstv %s1066_s12 }
  0x3e   :  { %v189_v52 = vadd.f32 %v188_v47, %v185_v25  ;;  %v205_v54 = vstv %s769_s13  ;;  %s775_s19 = sld [smem:[#allocation3 + $0x2d]] }
  0x3f   :  { %v175_v55 = vadd.f32 %v174_v50, %v172_v51  ;;  %v206_v56 = vmul.f32 %v205_v54, %v1057_v34  ;;  %v208_v57 = vstv %s770_s14  ;;  %s776_s20 = sld [smem:[#allocation3 + $0x2e]] }
  0x40   :  { %v209_v59 = vmul.f32 %v208_v57, %v1063_v36  ;;  %v212_v60 = vstv %s771_s15  ;;  %s777_s21 = sld [smem:[#allocation3 + $0x2f]]  ;;  %v193_v3 = vadd.f32 %v192_v53, %v189_v52 }
  0x41   :  { %vm176_vm4 = vcmp.gt.f32.partialorder %v175_v55, 0.0  ;;  %v177_v61 = vmul.f32 0.01, %v175_v55  ;;  %v213_v62 = vmul.f32 %v212_v60, %v1068_v38  ;;  %v216_v63 = vstv %s772_s16  ;;  %s778_s1 = sld [smem:[#allocation3 + $0x30]] }
  0x42   :  { %v210_v4 = vadd.f32 %v209_v59, %v206_v56  ;;  %v217_v5 = vmul.f32 %v216_v63, %v1075_v49  ;;  %v220_v6 = vstv %s773_s17  ;;  %s1086_s22 = sld [smem:[#allocation3 + $0x31]] }
  0x43   :  { %v178_v7 = vsel %vm176_vm4, %v175_v55, %v177_v61  ;;  %s1088_s0 = sld [smem:[#allocation3 + $0x39]]  ;;  %v224_v21 = vstv %s1078_s18 }
  0x44   :  { %v196_v8 = vmul.f32 %v195_v58, %v178_v7  ;;  %v214_v10 = vadd.f32 %v213_v62, %v210_v4  ;;  %v221_v11 = vmul.f32 %v220_v6, %v178_v7  ;;  %v230_v13 = vstv %s775_s19  ;;  %s1090_s23 = sld [smem:[#allocation3 + $0x32]] }
  0x45   :  { %v231_v15 = vmul.f32 %v230_v13, %v1057_v34  ;;  %v233_v16 = vstv %s776_s20  ;;  %s1094_s24 = sld [smem:[#allocation3 + $0x33]] }
  0x46   :  { %v197_v17 = vadd.f32 %v196_v8, %v193_v3  ;;  %v218_v18 = vadd.f32 %v217_v5, %v214_v10  ;;  %v234_v19 = vmul.f32 %v233_v16, %v1063_v36  ;;  %v237_v20 = vstv %s777_s21  ;;  %s1097_s25 = sld [smem:[#allocation3 + $0x34]] }
  0x47   :  { %v238_v22 = vmul.f32 %v237_v20, %v1068_v38  ;;  %v241_v23 = vstv %s778_s1  ;;  %s1101_s26 = sld [smem:[#allocation3 + $0x35]] }
  0x48   :  { %v200_v24 = vadd.f32 %v199_v14, %v197_v17  ;;  %v222_v26 = vadd.f32 %v221_v11, %v218_v18  ;;  %v235_v27 = vadd.f32 %v234_v19, %v231_v15  ;;  %v242_v28 = vmul.f32 %v241_v23, %v1075_v49  ;;  %s1104_s27 = sld [smem:[#allocation3 + $0x36]] }
  0x49   :  { %v245_v29 = vstv %s1086_s22  ;;  %s1107_s28 = sld [smem:[#allocation3 + $0x3a]]  ;;  %v249_v37 = vstv %s1088_s0 }
  0x4a   :  { %v225_v30 = vadd.f32 %v224_v21, %v222_v26  ;;  %v239_v31 = vadd.f32 %v238_v22, %v235_v27  ;;  %s1109_s29 = sld [smem:[#allocation3 + $0x3b]]  ;;  %vm201_vm5 = vcmp.gt.f32.partialorder %v200_v24, 0.0  ;;  %v246_v32 = vmul.f32 %v245_v29, %v178_v7 }
  0x4b   :  { %v255_v0 = vstv %s1090_s23  ;;  %v258_v33 = vstv %s1094_s24  ;;  %s1113_s30 = sld [smem:[#allocation3 + $0x3c]]  ;;  %v202_v35 = vmul.f32 0.01, %v200_v24 }
  0x4c   :  { %v227_v1 = vmul.f32 0.01, %v225_v30  ;;  %v243_v2 = vadd.f32 %v242_v28, %v239_v31  ;;  %s1116_s4 = sld [smem:[#allocation3 + $0x3d]]  ;;  %v256_v9 = vmul.f32 %v255_v0, %v1057_v34  ;;  %v259_v39 = vmul.f32 %v258_v33, %v1063_v36 }
  0x4d   :  { %v262_v40 = vstv %s1097_s25  ;;  %v266_v41 = vstv %s1101_s26  ;;  %s1122_s5 = sld [smem:[#allocation3 + $0x3e]]  ;;  %vm226_vm6 = vcmp.gt.f32.partialorder %v225_v30, 0.0  ;;  %v1130_v34 = vsel %vm201_vm5, %v200_v24, %v202_v35 }
  0x4e   :  { %v247_v42 = vadd.f32 %v246_v32, %v243_v2  ;;  %v263_v43 = vmul.f32 %v262_v40, %v1068_v38  ;;  %s1125_s6 = sld [smem:[#allocation3 + $0x53]]  ;;  %v260_v44 = vadd.f32 %v259_v39, %v256_v9  ;;  %v267_v12 = vmul.f32 %v266_v41, %v1075_v49 }
  0x4f   :  { %v270_v45 = vstv %s1104_s27  ;;  %s802_s7 = sld [smem:[#allocation3 + $0x47]]  ;;  %v1133_v47 = vsel %vm226_vm6, %v225_v30, %v227_v1  ;;  %v274_v54 = vstv %s1107_s28 }
  0x50   :  { %v250_v36 = vadd.f32 %v249_v37, %v247_v42  ;;  %v280_v46 = vstv %s1109_s29  ;;  %s803_s8 = sld [smem:[#allocation3 + $0x48]]  ;;  %v264_v48 = vadd.f32 %v263_v43, %v260_v44  ;;  %v271_v50 = vmul.f32 %v270_v45, %v178_v7 }
  0x51   :  { %v283_v38 = vstv %s1113_s30  ;;  %s804_s9 = sld [smem:[#allocation3 + $0x49]]  ;;  %v281_v49 = vmul.f32 %v280_v46, %v1130_v34 }
  0x52   :  { %vm251_vm7 = vcmp.gt.f32.partialorder %v250_v36, 0.0  ;;  %v252_v25 = vmul.f32 0.01, %v250_v36  ;;  %v284_v51 = vmul.f32 %v283_v38, %v1133_v47  ;;  %s1138_s10 = sld [smem:[#allocation3 + $0x4a]]  ;;  %v268_v52 = vadd.f32 %v267_v12, %v264_v48 }
  0x53   :  { %v287_v53 = vstv %s1116_s4  ;;  %s1141_s11 = sld [smem:[#allocation3 + $0x56]]  ;;  %v291_v4 = vstv %s1122_s5 }
  0x54   :  { %s1144_s12 = sld [smem:[#allocation3 + $0x59]]  ;;  %v1146_v55 = vsel %vm251_vm7, %v250_v36, %v252_v25  ;;  %v272_v56 = vadd.f32 %v271_v50, %v268_v52  ;;  %v285_v58 = vadd.f32 %v284_v51, %v281_v49  ;;  %v295_v16 = vstv %s1125_s6 }
  0x55   :  { %v334_v57 = vstv %s802_s7  ;;  %s1148_s13 = sld [smem:[#allocation3 + $0x5c]]  ;;  %v288_v59 = vmul.f32 %v287_v53, %v1146_v55 }
  0x56   :  { %v335_v60 = vmul.f32 %v334_v57, %v1130_v34  ;;  %v337_v61 = vstv %s803_s8  ;;  %s1152_s14 = sld [smem:[#allocation3 + $0x5f]]  ;;  %v275_v62 = vadd.f32 %v274_v54, %v272_v56 }
  0x57   :  { %v338_v63 = vmul.f32 %v337_v61, %v1133_v47  ;;  %v341_v3 = vstv %s804_s9  ;;  %s1155_s15 = sld [smem:[#allocation3 + $0x62]]  ;;  %v289_v10 = vadd.f32 %v288_v59, %v285_v58  ;;  %v29_v58 = vld [vmem:[%s1550_s2] sm:$0xff] }
  0x58   :  { %v342_v5 = vmul.f32 %v341_v3, %v1146_v55  ;;  %s792_s16 = sld [smem:[#allocation3 + $0x3f]]  ;;  %vm276_vm8 = vcmp.gt.f32.partialorder %v275_v62, 0.0  ;;  %v277_v6 = vmul.f32 0.01, %v275_v62  ;;  %v345_v8 = vstv %s1138_s10 }
  0x59   :  { %v339_v7 = vadd.f32 %v338_v63, %v335_v60  ;;  %s793_s17 = sld [smem:[#allocation3 + $0x40]]  ;;  %v349_v17 = vstv %s1141_s11 }
  0x5a   :  { %s794_s18 = sld [smem:[#allocation3 + $0x41]]  ;;  %v1160_v11 = vsel %vm276_vm8, %v275_v62, %v277_v6 }
  0x5b   :  { %v343_v13 = vadd.f32 %v342_v5, %v339_v7  ;;  %s795_s19 = sld [smem:[#allocation3 + $0x42]]  ;;  %v292_v14 = vmul.f32 %v291_v4, %v1160_v11  ;;  %v346_v15 = vmul.f32 %v345_v8, %v1160_v11 }
  0x5c   :  { %s1164_s20 = sld [smem:[#allocation3 + $0x54]] }
  0x5d   :  { %s807_s21 = sld [smem:[#allocation3 + $0x4b]]  ;;  %v293_v18 = vadd.f32 %v292_v14, %v289_v10  ;;  %v347_v19 = vadd.f32 %v346_v15, %v343_v13 }
  0x5e   :  { %v298_v20 = vstv %s792_s16  ;;  %s808_s1 = sld [smem:[#allocation3 + $0x4c]] }
  0x5f   :  { %v299_v21 = vmul.f32 %v298_v20, %v1130_v34  ;;  %v301_v22 = vstv %s793_s17  ;;  %s809_s22 = sld [smem:[#allocation3 + $0x4d]]  ;;  %v1169_v23 = vadd.f32 %v295_v16, %v293_v18  ;;  %v350_v24 = vadd.f32 %v349_v17, %v347_v19  ;;  %v727_v19 = vld [vmem:[%s1550_s2 + $0x8] sm:$0xff] }
  0x60   :  { %v302_v26 = vmul.f32 %v301_v22, %v1133_v47  ;;  %v305_v27 = vstv %s794_s18  ;;  %s810_s0 = sld [smem:[#allocation3 + $0x4e]] }
  0x61   :  { %v306_v28 = vmul.f32 %v305_v27, %v1146_v55  ;;  %v309_v29 = vstv %s795_s19  ;;  %s1173_s23 = sld [smem:[#allocation3 + $0x57]]  ;;  %v387_v30 = vmul.f32 0.5, %v350_v24  ;;  %896 = vst [vmem:[%s1551_s3 + $0x18] sm:$0xff] %v1169_v23  ;;  %899 = vst [vmem:[%s1551_s3 + $0x30] sm:$0xff] %v350_v24  ;;  %v403_v24 = vstv %s1144_s12 }
  0x62   :  { %v303_v31 = vadd.f32 %v302_v26, %v299_v21  ;;  %v310_v32 = vmul.f32 %v309_v29, %v1160_v11  ;;  %s1183_s28 = sld [smem:[#allocation3 + $0x5a]]  ;;  %v313_v37 = vstv %s1164_s20  ;;  %v418_v26 = vstv %s1148_s13 }
  0x63   :  { %v352_v0 = vstv %s807_s21  ;;  %s1185_s29 = sld [smem:[#allocation3 + $0x5d]]  ;;  %v388_v33 = vmul.f32 1.442695, %v387_v30  ;;  %v433_v27 = vstv %s1152_s14 }
  0x64   :  { %v307_v35 = vadd.f32 %v306_v28, %v303_v31  ;;  %v353_v1 = vmul.f32 %v352_v0, %v1130_v34  ;;  %v355_v2 = vstv %s808_s1  ;;  %s1188_s30 = sld [smem:[#allocation3 + $0x60]]  ;;  %v448_v28 = vstv %s1155_s15 }
  0x65   :  { %v356_v9 = vmul.f32 %v355_v2, %v1133_v47  ;;  %v359_v39 = vstv %s809_s22  ;;  %s1192_s4 = sld [smem:[#allocation3 + $0x63]]  ;;  %909 = vpow2.f32 %v388_v33 }
  0x66   :  { %v311_v40 = vadd.f32 %v310_v32, %v307_v35  ;;  %v360_v41 = vmul.f32 %v359_v39, %v1146_v55  ;;  %v363_v42 = vstv %s810_s0  ;;  %s797_s5 = sld [smem:[#allocation3 + $0x43]] }
  0x67   :  { %v357_v43 = vadd.f32 %v356_v9, %v353_v1  ;;  %v364_v44 = vmul.f32 %v363_v42, %v1160_v11  ;;  %s798_s6 = sld [smem:[#allocation3 + $0x44]]  ;;  %v367_v36 = vstv %s1173_s23 }
  0x68   :  { %v1196_v12 = vadd.f32 %v313_v37, %v311_v40  ;;  %s799_s7 = sld [smem:[#allocation3 + $0x45]]  ;;  %v406_v29 = vstv %s1183_s28  ;;  %v728_v40 = vld [vmem:[%s1550_s2 + $0x10] sm:$0xff] }
  0x69   :  { %v361_v45 = vadd.f32 %v360_v41, %v357_v43  ;;  %s800_s8 = sld [smem:[#allocation3 + $0x46]]  ;;  %v421_v30 = vstv %s1185_s29 }
  0x6a   :  { %897 = vst [vmem:[%s1551_s3 + $0x20] sm:$0xff] %v1196_v12  ;;  %s1203_s11 = sld [smem:[#allocation3 + $0x55]]  ;;  %v436_v31 = vstv %s1188_s30 }
  0x6b   :  { %v365_v46 = vadd.f32 %v364_v44, %v361_v45  ;;  %s812_s16 = sld [smem:[#allocation3 + $0x4f]]  ;;  %v451_v0 = vstv %s1192_s4 }
  0x6c   :  { %v316_v48 = vstv %s797_s5  ;;  %s813_s17 = sld [smem:[#allocation3 + $0x50]] }
  0x6d   :  { %v368_v50 = vadd.f32 %v367_v36, %v365_v46  ;;  %v317_v38 = vmul.f32 %v316_v48, %v1130_v34  ;;  %v319_v25 = vstv %s798_s6  ;;  %s814_s18 = sld [smem:[#allocation3 + $0x51]] }
  0x6e   :  { %v320_v49 = vmul.f32 %v319_v25, %v1133_v47  ;;  %v323_v51 = vstv %s799_s7  ;;  %s815_s19 = sld [smem:[#allocation3 + $0x52]] }
  0x6f   :  { %v392_v52 = vmul.f32 0.5, %v368_v50  ;;  %900 = vst [vmem:[%s1551_s3 + $0x38] sm:$0xff] %v368_v50  ;;  %v324_v53 = vmul.f32 %v323_v51, %v1146_v55  ;;  %v327_v54 = vstv %s800_s8  ;;  %s1211_s1 = sld [smem:[#allocation3 + $0x58]] }
  0x70   :  { %v321_v56 = vadd.f32 %v320_v49, %v317_v38  ;;  %v328_v57 = vmul.f32 %v327_v54, %v1160_v11  ;;  %s1214_s22 = sld [smem:[#allocation3 + $0x5b]]  ;;  %v331_v4 = vstv %s1203_s11 }
  0x71   :  { %v393_v59 = vmul.f32 1.442695, %v392_v52  ;;  %v370_v60 = vstv %s812_s16  ;;  %s1219_s24 = sld [smem:[#allocation3 + $0x65]] }
  0x72   :  { %v325_v61 = vadd.f32 %v324_v53, %v321_v56  ;;  %v371_v62 = vmul.f32 %v370_v60, %v1130_v34  ;;  %v373_v63 = vstv %s813_s17  ;;  %s1222_s25 = sld [smem:[#allocation3 + $0x5e]]  ;;  %v910_v3 = vpop.eup %909 }
  0x73   :  { %911 = vpow2.f32 %v393_v59  ;;  %v374_v5 = vmul.f32 %v373_v63, %v1133_v47  ;;  %v377_v6 = vstv %s814_s18  ;;  %s1226_s26 = sld [smem:[#allocation3 + $0x66]]  ;;  %v390_v7 = vmul.f32 %v910_v3, %v29_v58 }
  0x74   :  { %v329_v8 = vadd.f32 %v328_v57, %v325_v61  ;;  %v378_v10 = vmul.f32 %v377_v6, %v1146_v55  ;;  %v381_v13 = vstv %s815_s19  ;;  %s1229_s27 = sld [smem:[#allocation3 + $0x61]] }
  0x75   :  { %v375_v34 = vadd.f32 %v374_v5, %v371_v62  ;;  %v382_v14 = vmul.f32 %v381_v13, %v1160_v11  ;;  %s1232_s5 = sld [smem:[#allocation3 + $0x67]]  ;;  %v391_v15 = vadd.f32 %v390_v7, %v1169_v23  ;;  %v385_v55 = vstv %s1211_s1 }
  0x76   :  { %v1235_v16 = vadd.f32 %v331_v4, %v329_v8  ;;  %s1237_s6 = sld [smem:[#allocation3 + $0x64]]  ;;  %v410_v33 = vstv %s1214_s22 }
  0x77   :  { %v379_v47 = vadd.f32 %v378_v10, %v375_v34  ;;  %s1239_s7 = sld [smem:[#allocation3 + $0x68]]  ;;  %689 = vst [vmem:[%s1551_s3] sm:$0xff] %v391_v15  ;;  %v404_v32 = vmul.f32 %v403_v24, %v391_v15  ;;  %v414_v35 = vstv %s1219_s24  ;;  %v419_v1 = vmul.f32 %v418_v26, %v391_v15 }
  0x78   :  { %898 = vst [vmem:[%s1551_s3 + $0x28] sm:$0xff] %v1235_v16  ;;  %s1249_s16 = sld [smem:[#allocation3 + $0x69]]  ;;  %v434_v2 = vmul.f32 %v433_v27, %v391_v15  ;;  %v449_v37 = vmul.f32 %v448_v28, %v391_v15  ;;  %v425_v9 = vstv %s1222_s25 }
  0x79   :  { %v383_v11 = vadd.f32 %v382_v14, %v379_v47  ;;  %s1251_s17 = sld [smem:[#allocation3 + $0x6a]]  ;;  %v429_v41 = vstv %s1226_s26 }
  0x7a   :  { %s1253_s18 = sld [smem:[#allocation3 + $0x6b]]  ;;  %v440_v42 = vstv %s1229_s27 }
  0x7b   :  { %v386_v17 = vadd.f32 %v385_v55, %v383_v11  ;;  %s1255_s19 = sld [smem:[#allocation3 + $0x6c]]  ;;  %v444_v43 = vstv %s1232_s5 }
  0x7c   :  { %s1257_s20 = sld [smem:[#allocation3 + $0x7d]]  ;;  %v455_v36 = vstv %s1237_s6 }
  0x7d   :  { %v397_v18 = vmul.f32 0.5, %v386_v17  ;;  %901 = vst [vmem:[%s1551_s3 + $0x40] sm:$0xff] %v386_v17  ;;  %s1262_s0 = sld [smem:[#allocation3 + $0x6d]]  ;;  %v459_v48 = vstv %s1239_s7 }
  0x7e   :  { %s1267_s9 = sld [smem:[#allocation3 + $0x6e]]  ;;  %v463_v50 = vstv %s1249_s16 }
  0x7f   :  { %v398_v20 = vmul.f32 1.442695, %v397_v18  ;;  %s1269_s10 = sld [smem:[#allocation3 + $0x6f]]  ;;  %v466_v38 = vstv %s1251_s17 }
  0x80   :  { %v912_v21 = vpop.eup %911  ;;  %s1271_s11 = sld [smem:[#allocation3 + $0x70]]  ;;  %v470_v25 = vstv %s1253_s18 }
  0x81   :  { %v395_v22 = vmul.f32 %v912_v21, %v727_v19  ;;  %913 = vpow2.f32 %v398_v20  ;;  %s1273_s21 = sld [smem:[#allocation3 + $0x7e]]  ;;  %v474_v51 = vstv %s1255_s19 }
  0x82   :  { %s1275_s1 = sld [smem:[#allocation3 + $0x71]]  ;;  %v478_v52 = vstv %s1257_s20 }
  0x83   :  { %1553 = sst [smem:[#allocation5_spill]] %s1262_s0  ;;  %v396_v23 = vadd.f32 %v395_v22, %v1196_v12 }
  0x84   :  { %1554 = sst [smem:[#allocation6_spill]] %s1267_s9 }
  0x85   :  { %1555 = sst [smem:[#allocation7_spill]] %s1269_s10  ;;  %894 = vst [vmem:[%s1551_s3 + $0x8] sm:$0xff] %v396_v23  ;;  %v407_v39 = vmul.f32 %v406_v29, %v396_v23  ;;  %v422_v44 = vmul.f32 %v421_v30, %v396_v23  ;;  %v437_v12 = vmul.f32 %v436_v31, %v396_v23  ;;  %v452_v45 = vmul.f32 %v451_v0, %v396_v23 }
  0x86   :  { %1556 = sst [smem:[#allocation8_spill]] %s1271_s11 }
  0x87   :  { %1557 = sst [smem:[#allocation9_spill]] %s1273_s21  ;;  %v408_v54 = vadd.f32 %v407_v39, %v404_v32  ;;  %v423_v59 = vadd.f32 %v422_v44, %v419_v1  ;;  %v438_v60 = vadd.f32 %v437_v12, %v434_v2  ;;  %v453_v61 = vadd.f32 %v452_v45, %v449_v37 }
  0x88   :  { %s1278_s23 = sld [smem:[#allocation3 + $0x72]]  ;;  %v501_v3 = vstv %s1275_s1 }
  0x89   :  { %s1280_s8 = sld [smem:[#allocation3 + $0x73]] }
  0x8a   :  { %s1285_s11 = sld [smem:[#allocation3 + $0x74]] }
  0x8b   :  { %s1287_s0 = sld [smem:[#allocation3 + $0x7f]] }
  0x8c   :  { %s1290_s21 = sld [smem:[#allocation3 + $0x75]] }
  0x8d   :  { %s1300_s9 = sld [smem:[#allocation3 + $0x77]] }
  0x8e   :  { %1558 = sst [smem:[#allocation10_spill]] %s1278_s23  ;;  %v914_v46 = vpop.eup %913 }
  0x8f   :  { %s1295_s23 = sld [smem:[#allocation3 + $0x76]]  ;;  %v400_v49 = vmul.f32 %v914_v46, %v728_v40  ;;  %v508_v5 = vstv %s1280_s8 }
  0x90   :  { %s1305_s12 = sld [smem:[#allocation3 + $0x78]]  ;;  %v512_v13 = vstv %s1285_s11 }
  0x91   :  { %s1308_s13 = sld [smem:[#allocation3 + $0x80]]  ;;  %v401_v62 = vadd.f32 %v400_v49, %v1235_v16  ;;  %v516_v34 = vstv %s1287_s0 }
  0x92   :  { %s1559_s28 = sld [smem:[#allocation5_spill]]  ;;  %v520_v14 = vstv %s1290_s21 }
  0x93   :  { %s1316_s29 = sld [smem:[#allocation3 + $0x79]]  ;;  %v411_v6 = vmul.f32 %v410_v33, %v401_v62  ;;  %v426_v7 = vmul.f32 %v425_v9, %v401_v62  ;;  %v441_v8 = vmul.f32 %v440_v42, %v401_v62  ;;  %v456_v10 = vmul.f32 %v455_v36, %v401_v62  ;;  %895 = vst [vmem:[%s1551_s3 + $0x10] sm:$0xff] %v401_v62 }
  0x94   :  { %s1560_s30 = sld [smem:[#allocation6_spill]]  ;;  %v527_v17 = vstv %s1300_s9 }
  0x95   :  { %s1561_s4 = sld [smem:[#allocation7_spill]]  ;;  %v523_v15 = vstv %s1295_s23  ;;  %v412_v16 = vadd.f32 %v411_v6, %v408_v54  ;;  %v427_v47 = vadd.f32 %v426_v7, %v423_v59  ;;  %v442_v55 = vadd.f32 %v441_v8, %v438_v60 }
  0x96   :  { %s1562_s22 = sld [smem:[#allocation8_spill]]  ;;  %v457_v11 = vadd.f32 %v456_v10, %v453_v61  ;;  %v531_v18 = vstv %s1305_s12 }
  0x97   :  { %s1319_s25 = sld [smem:[#allocation3 + $0x7a]]  ;;  %v535_v19 = vstv %s1308_s13  ;;  %v415_v21 = vadd.f32 %v414_v35, %v412_v16  ;;  %v430_v22 = vadd.f32 %v429_v41, %v427_v47  ;;  %v445_v23 = vadd.f32 %v444_v43, %v442_v55 }
  0x98   :  { %s1325_s2 = sld [smem:[#allocation3 + $0x7b]]  ;;  %v482_v53 = vstv %s1559_s28  ;;  %v460_v24 = vadd.f32 %v459_v48, %v457_v11 }
  0x99   :  { %s1563_s26 = sld [smem:[#allocation9_spill]]  ;;  %v539_v20 = vstv %s1316_s29  ;;  %v416_v30 = vmax.f32 %v415_v21, 0.0  ;;  %v431_v31 = vmax.f32 %v430_v22, 0.0  ;;  %v446_v32 = vmax.f32 %v445_v23, 0.0 }
  0x9a   :  { %s1564_s27 = sld [smem:[#allocation10_spill]]  ;;  %v485_v56 = vstv %s1560_s30  ;;  %v461_v0 = vmax.f32 %v460_v24, 0.0 }
  0x9b   :  { %s1330_s5 = sld [smem:[#allocation3 + $0x7c]]  ;;  %v489_v57 = vstv %s1561_s4  ;;  %v464_v37 = vmul.f32 %v463_v50, %v416_v30  ;;  %v467_v9 = vmul.f32 %v466_v38, %v431_v31  ;;  %v471_v39 = vmul.f32 %v470_v25, %v446_v32 }
  0x9c   :  { %v493_v58 = vstv %s1562_s22  ;;  %s1335_s6 = sld [smem:[#allocation3 + $0x81]]  ;;  %v475_v40 = vmul.f32 %v474_v51, %v461_v0  ;;  %v483_v41 = vmul.f32 %v482_v53, %v416_v30  ;;  %v486_v42 = vmul.f32 %v485_v56, %v431_v31 }
  0x9d   :  { %s1338_s7 = sld [smem:[#allocation3 + $0x82]]  ;;  %v542_v26 = vstv %s1319_s25  ;;  %v490_v43 = vmul.f32 %v489_v57, %v446_v32  ;;  %v494_v44 = vmul.f32 %v493_v58, %v461_v0  ;;  %v468_v12 = vadd.f32 %v467_v9, %v464_v37 }
  0x9e   :  { %s1344_s19 = sld [smem:[#allocation3 + $0x83]]  ;;  %v546_v27 = vstv %s1325_s2  ;;  %v502_v45 = vmul.f32 %v501_v3, %v416_v30  ;;  %v509_v46 = vmul.f32 %v508_v5, %v446_v32  ;;  %v487_v48 = vadd.f32 %v486_v42, %v483_v41 }
  0x9f   :  { %v497_v63 = vstv %s1563_s26  ;;  %s1349_s15 = sld [smem:[#allocation3 + $0x84]]  ;;  %v513_v50 = vmul.f32 %v512_v13, %v461_v0  ;;  %v521_v38 = vmul.f32 %v520_v14, %v416_v30  ;;  %v524_v49 = vmul.f32 %v523_v15, %v431_v31 }
  0xa0   :  { %v504_v4 = vstv %s1564_s27  ;;  %s1355_s1 = sld [smem:[#allocation3 + $0x85]]  ;;  %v472_v25 = vadd.f32 %v471_v39, %v468_v12  ;;  %v528_v53 = vmul.f32 %v527_v17, %v446_v32  ;;  %v532_v54 = vmul.f32 %v531_v18, %v461_v0 }
  0xa1   :  { %s1361_s8 = sld [smem:[#allocation3 + $0x86]]  ;;  %v550_v28 = vstv %s1330_s5  ;;  %v505_v36 = vmul.f32 %v504_v4, %v431_v31  ;;  %v491_v56 = vadd.f32 %v490_v43, %v487_v48  ;;  %v525_v57 = vadd.f32 %v524_v49, %v521_v38 }
  0xa2   :  { %s1365_s11 = sld [smem:[#allocation3 + $0xa0]]  ;;  %v554_v29 = vstv %s1335_s6  ;;  %v540_v58 = vmul.f32 %v539_v20, %v416_v30  ;;  %v543_v59 = vmul.f32 %v542_v26, %v431_v31  ;;  %v476_v60 = vadd.f32 %v475_v40, %v472_v25 }
  0xa3   :  { %s1371_s21 = sld [smem:[#allocation3 + $0x87]]  ;;  %v558_v33 = vstv %s1338_s7  ;;  %v506_v51 = vadd.f32 %v505_v36, %v502_v45  ;;  %v547_v62 = vmul.f32 %v546_v27, %v446_v32  ;;  %v551_v3 = vmul.f32 %v550_v28, %v461_v0 }
  0xa4   :  { %s1373_s24 = sld [smem:[#allocation3 + $0x88]]  ;;  %v561_v35 = vstv %s1344_s19  ;;  %v495_v4 = vadd.f32 %v494_v44, %v491_v56  ;;  %v529_v5 = vadd.f32 %v528_v53, %v525_v57  ;;  %v544_v6 = vadd.f32 %v543_v59, %v540_v58 }
  0xa5   :  { %v565_v1 = vstv %s1349_s15  ;;  %s1379_s23 = sld [smem:[#allocation3 + $0x89]]  ;;  %v510_v61 = vadd.f32 %v509_v46, %v506_v51  ;;  %v479_v8 = vadd.f32 %v478_v52, %v476_v60 }
  0xa6   :  { %v569_v2 = vstv %s1355_s1  ;;  %s1387_s9 = sld [smem:[#allocation3 + $0x8a]]  ;;  %v498_v15 = vadd.f32 %v497_v63, %v495_v4  ;;  %v533_v16 = vadd.f32 %v532_v54, %v529_v5  ;;  %v548_v47 = vadd.f32 %v547_v62, %v544_v6 }
  0xa7   :  { %s1389_s12 = sld [smem:[#allocation3 + $0x8b]]  ;;  %v573_v7 = vstv %s1361_s8  ;;  %v514_v10 = vadd.f32 %v513_v50, %v510_v61  ;;  %v1415_v11 = vmax.f32 %v479_v8, 0.0 }
  0xa8   :  { %s1391_s28 = sld [smem:[#allocation3 + $0xa1]]  ;;  %v577_v13 = vstv %s1365_s11  ;;  %v1423_v20 = vmax.f32 %v498_v15, 0.0  ;;  %v536_v63 = vadd.f32 %v535_v19, %v533_v16  ;;  %v552_v21 = vadd.f32 %v551_v3, %v548_v47 }
  0xa9   :  { %s1393_s16 = sld [smem:[#allocation3 + $0x8c]]  ;;  %v580_v14 = vstv %s1371_s21  ;;  %v517_v52 = vadd.f32 %v516_v34, %v514_v10  ;;  %v559_v34 = vmul.f32 %v558_v33, %v1415_v11 }
  0xaa   :  { %s1395_s17 = sld [smem:[#allocation3 + $0x8d]]  ;;  %v583_v55 = vstv %s1373_s24  ;;  %v581_v24 = vmul.f32 %v580_v14, %v1415_v11  ;;  %v1439_v27 = vmax.f32 %v536_v63, 0.0  ;;  %v555_v19 = vadd.f32 %v554_v29, %v552_v21 }
  0xab   :  { %s1397_s18 = sld [smem:[#allocation3 + $0x8e]]  ;;  %v587_v17 = vstv %s1379_s23  ;;  %v1430_v23 = vmax.f32 %v517_v52, 0.0  ;;  %v562_v28 = vmul.f32 %v561_v35, %v1423_v20  ;;  %v584_v30 = vmul.f32 %v583_v55, %v1423_v20 }
  0xac   :  { %s1399_s29 = sld [smem:[#allocation3 + $0x8f]]  ;;  %v591_v18 = vstv %s1387_s9  ;;  %v1457_v37 = vmax.f32 %v555_v19, 0.0  ;;  %v570_v35 = vmul.f32 %v569_v2, %v1439_v27 }
  0xad   :  { %s1402_s30 = sld [smem:[#allocation3 + $0x90]]  ;;  %v595_v22 = vstv %s1389_s12  ;;  %v566_v31 = vmul.f32 %v565_v1, %v1430_v23  ;;  %v588_v32 = vmul.f32 %v587_v17, %v1430_v23  ;;  %v563_v29 = vadd.f32 %v562_v28, %v559_v34 }
  0xae   :  { %s1408_s4 = sld [smem:[#allocation3 + $0xa2]]  ;;  %v599_v26 = vstv %s1391_s28  ;;  %v585_v9 = vadd.f32 %v584_v30, %v581_v24  ;;  %v592_v39 = vmul.f32 %v591_v18, %v1439_v27  ;;  %v574_v43 = vmul.f32 %v573_v7, %v1457_v37 }
  0xaf   :  { %s1413_s22 = sld [smem:[#allocation3 + $0x91]]  ;;  %v602_v0 = vstv %s1393_s16  ;;  %v567_v42 = vadd.f32 %v566_v31, %v563_v29  ;;  %v596_v2 = vmul.f32 %v595_v22, %v1457_v37 }
  0xb0   :  { %s1421_s20 = sld [smem:[#allocation3 + $0x92]]  ;;  %v605_v33 = vstv %s1395_s17  ;;  %v603_v1 = vmul.f32 %v602_v0, %v1415_v11  ;;  %v589_v44 = vadd.f32 %v588_v32, %v585_v9 }
  0xb1   :  { %s1428_s25 = sld [smem:[#allocation3 + $0x93]]  ;;  %v606_v40 = vmul.f32 %v605_v33, %v1423_v20  ;;  %v609_v41 = vstv %s1397_s18  ;;  %v571_v48 = vadd.f32 %v570_v35, %v567_v42 }
  0xb2   :  { %s1437_s0 = sld [smem:[#allocation3 + $0x94]]  ;;  %v610_v45 = vmul.f32 %v609_v41, %v1430_v23  ;;  %v613_v36 = vstv %s1399_s29  ;;  %v593_v50 = vadd.f32 %v592_v39, %v589_v44 }
  0xb3   :  { %s1447_s13 = sld [smem:[#allocation3 + $0x95]]  ;;  %v607_v12 = vadd.f32 %v606_v40, %v603_v1  ;;  %v617_v46 = vstv %s1402_s30  ;;  %v614_v38 = vmul.f32 %v613_v36, %v1439_v27  ;;  %v575_v56 = vadd.f32 %v574_v43, %v571_v48 }
  0xb4   :  { %s1455_s2 = sld [smem:[#allocation3 + $0xa3]]  ;;  %v618_v49 = vmul.f32 %v617_v46, %v1457_v37  ;;  %v621_v51 = vstv %s1408_s4  ;;  %v597_v57 = vadd.f32 %v596_v2, %v593_v50 }
  0xb5   :  { %s1462_s26 = sld [smem:[#allocation3 + $0x96]]  ;;  %v611_v25 = vadd.f32 %v610_v45, %v607_v12  ;;  %v624_v53 = vstv %s1413_s22  ;;  %v578_v4 = vadd.f32 %v577_v13, %v575_v56 }
  0xb6   :  { %s1468_s27 = sld [smem:[#allocation3 + $0x97]]  ;;  %v627_v54 = vstv %s1421_s20  ;;  %v625_v58 = vmul.f32 %v624_v53, %v1415_v11  ;;  %v600_v5 = vadd.f32 %v599_v26, %v597_v57 }
  0xb7   :  { %s1472_s5 = sld [smem:[#allocation3 + $0x98]]  ;;  %v628_v59 = vmul.f32 %v627_v54, %v1423_v20  ;;  %v615_v60 = vadd.f32 %v614_v38, %v611_v25  ;;  %v631_v61 = vstv %s1428_s25  ;;  %902 = vst [vmem:[%s1551_s3 + $0x48] sm:$0xff] %v578_v4 }
  0xb8   :  { %s1477_s6 = sld [smem:[#allocation3 + $0x99]]  ;;  %v635_v62 = vstv %s1437_s0  ;;  %v632_v7 = vmul.f32 %v631_v61, %v1430_v23  ;;  %903 = vst [vmem:[%s1551_s3 + $0x50] sm:$0xff] %v600_v5 }
  0xb9   :  { %s1481_s7 = sld [smem:[#allocation3 + $0x9a]]  ;;  %v639_v3 = vstv %s1447_s13  ;;  %v629_v6 = vadd.f32 %v628_v59, %v625_v58  ;;  %v619_v8 = vadd.f32 %v618_v49, %v615_v60  ;;  %v636_v10 = vmul.f32 %v635_v62, %v1439_v27 }
  0xba   :  { %s1486_s19 = sld [smem:[#allocation3 + $0x9b]]  ;;  %v640_v14 = vmul.f32 %v639_v3, %v1457_v37  ;;  %v643_v21 = vstv %s1455_s2 }
  0xbb   :  { %s1490_s10 = sld [smem:[#allocation3 + $0x9c]]  ;;  %v633_v13 = vadd.f32 %v632_v7, %v629_v6  ;;  %v646_v15 = vstv %s1462_s26  ;;  %v622_v55 = vadd.f32 %v621_v51, %v619_v8 }
  0xbc   :  { %s1495_s14 = sld [smem:[#allocation3 + $0x9d]]  ;;  %v649_v16 = vstv %s1468_s27  ;;  %v647_v52 = vmul.f32 %v646_v15, %v1415_v11 }
  0xbd   :  { %s1500_s15 = sld [smem:[#allocation3 + $0x9e]]  ;;  %v653_v47 = vstv %s1472_s5  ;;  %v650_v17 = vmul.f32 %v649_v16, %v1423_v20  ;;  %v637_v63 = vadd.f32 %v636_v10, %v633_v13  ;;  %904 = vst [vmem:[%s1551_s3 + $0x58] sm:$0xff] %v622_v55 }
  0xbe   :  { %s1504_s1 = sld [smem:[#allocation3 + $0x9f]]  ;;  %v654_v18 = vmul.f32 %v653_v47, %v1430_v23  ;;  %v657_v22 = vstv %s1477_s6 }
  0xbf   :  { %s1515_s23 = sld [smem:[#allocation3 + $0xa4]]  ;;  %v661_v34 = vstv %s1481_s7  ;;  %v651_v24 = vadd.f32 %v650_v17, %v647_v52  ;;  %v658_v26 = vmul.f32 %v657_v22, %v1439_v27  ;;  %v641_v30 = vadd.f32 %v640_v14, %v637_v63 }
  0xc0   :  { %v662_v19 = vmul.f32 %v661_v34, %v1457_v37  ;;  %v668_v28 = vstv %s1486_s19  ;;  %s893_s28 = sld [smem:[#allocation3 + $0xa5]] }
  0xc1   :  { %v669_v31 = vmul.f32 %v668_v28, %v1415_v11  ;;  %v671_v32 = vstv %s1490_s10  ;;  %v655_v33 = vadd.f32 %v654_v18, %v651_v24  ;;  %v644_v39 = vadd.f32 %v643_v21, %v641_v30 }
  0xc2   :  { %v675_v0 = vstv %s1495_s14  ;;  %v672_v29 = vmul.f32 %v671_v32, %v1423_v20 }
  0xc3   :  { %v676_v35 = vmul.f32 %v675_v0, %v1430_v23  ;;  %v679_v9 = vstv %s1500_s15  ;;  %v659_v40 = vadd.f32 %v658_v26, %v655_v33  ;;  %905 = vst [vmem:[%s1551_s3 + $0x60] sm:$0xff] %v644_v39 }
  0xc4   :  { %v683_v1 = vstv %s1504_s1  ;;  %v673_v41 = vadd.f32 %v672_v29, %v669_v31  ;;  %v680_v42 = vmul.f32 %v679_v9, %v1439_v27 }
  0xc5   :  { %v665_v11 = vstv %s1515_s23  ;;  %v663_v43 = vadd.f32 %v662_v19, %v659_v40  ;;  %v684_v2 = vmul.f32 %v683_v1, %v1457_v37 }
  0xc6   :  { %v677_v44 = vadd.f32 %v676_v35, %v673_v41  ;;  %v687_v45 = vstv %s893_s28 }
  0xc7   :  { %v666_v12 = vadd.f32 %v665_v11, %v663_v43 }
  0xc8   :  { %v681_v20 = vadd.f32 %v680_v42, %v677_v44 }
  0xc9   :  { %906 = vst [vmem:[%s1551_s3 + $0x68] sm:$0xff] %v666_v12 }
  0xca   :  { %v685_v23 = vadd.f32 %v684_v2, %v681_v20 }
  0xcc   :  { %v688_v36 = vadd.f32 %v687_v45, %v685_v23 }
  0xce   :  { %907 = vst [vmem:[%s1551_s3 + $0x70] sm:$0xff] %v688_v36 }

</bundles_post_ra>
